<compile_context>
chip_gen: v7x
topology: tpu7x:2x2x1
jax: 0.10.0
libtpu: 0.0.40
codegen_flags: <defaults>
</compile_context>

<pallas_src>
from functools import partial

import jax
import jax.numpy as jnp
from jax import lax
from jax.experimental import pallas as pl
from jax.experimental.pallas import tpu as pltpu

HIDDEN = 64
N_BRANCH = 7
N_BRANCH_PAD = 8                 # scalar-input lane dim padded 7 -> 8
CONCAT = N_BRANCH * HIDDEN       # 448
K_CHUNK = 256                    # MXU-friendly fc1 K chunk (2x256 = 512)
K_PAD = 2 * K_CHUNK              # 512 (rows 448..511 of w1 are zero)
LANE = 128
SUBLANE = 8
TILE_M_MAX = 2048                # batch rows per grid step (upper bound)


def _round_up(x, m):
    return ((x + m - 1) // m) * m


def _cdiv(a, b):
    return -(-a // b)


# ----------------------------------------------------------------------------
# Kernel
# ----------------------------------------------------------------------------
def _mlp7_kernel(x_ref, wbr_ref, bbr_ref, w1_ref, b1_ref, w2_ref, b2_ref, o_ref):
    # x_ref:   [TM, 8]         stacked scalars C..I (+ zero pad col), f32
    # wbr_ref: [8, 64]         per-branch weights (row 7 unused), f32
    # bbr_ref: [8, 64]         per-branch biases  (row 7 unused), f32
    # w1_ref:  [512, 64]       fc1 weight^T, rows 448..511 zero (mm dtype)
    # b1_ref:  [1, 64]         fc1 bias, f32
    # w2_ref:  [OUT_P8, 64]    fc2 weight (PyTorch layout), zero pad rows (mm dtype)
    # b2_ref:  [OUT_P8, 1]     fc2 bias, zero padded, f32
    # o_ref:   [OUT_P8, TM]    transposed, lane-dense output, f32
    x = x_ref[...]                                        # [TM, 8]
    tm = x.shape[0]
    mm_dtype = w1_ref.dtype

    # Branch Linears(1->64) + ReLU on the VPU (broadcast outer products).
    # Cast to the matmul dtype before concatenation so only the (bf16/f32)
    # 256-lane chunks materialize in VMEM, with unmasked lane-dense stores.
    def branch(k):
        h = x[:, k:k + 1] * wbr_ref[k:k + 1, :] + bbr_ref[k:k + 1, :]
        return jnp.maximum(h, 0.0).astype(mm_dtype)

    h_lo = jnp.concatenate([branch(0), branch(1), branch(2), branch(3)],
                           axis=1)                        # [TM, 256]
    h_hi = jnp.concatenate([branch(4), branch(5), branch(6),
                            jnp.zeros((tm, HIDDEN), mm_dtype)],
                           axis=1)                        # [TM, 256] (pad slot inert: w1 rows are zero)

    # fc1 + ReLU as two 256-deep partial MXU matmuls, f32 accumulation.
    acc = jnp.dot(h_lo, w1_ref[0:K_CHUNK, :],
                  preferred_element_type=jnp.float32)
    acc = acc + jnp.dot(h_hi, w1_ref[K_CHUNK:K_PAD, :],
                        preferred_element_type=jnp.float32)
    h1 = jnp.maximum(acc + b1_ref[...], 0.0)              # [TM, 64] f32

    # fc2, emitted transposed: [OUT_P8, 64] x [TM, 64] -> [OUT_P8, TM]
    # (contract on the 64-dim of both operands, same pattern as q @ k^T).
    out_t = lax.dot_general(w2_ref[...], h1.astype(w2_ref.dtype),
                            dimension_numbers=(((1,), (1,)), ((), ())),
                            preferred_element_type=jnp.float32)
    o_ref[...] = (out_t + b2_ref[...]).astype(o_ref.dtype)


# ----------------------------------------------------------------------------
# One-time parameter preparation (hoisted out of the per-call path)
# ----------------------------------------------------------------------------
def init_params(key, output_dim):
    """Deterministic init; shapes match MLPModel7.__init__ (PyTorch layout)."""
    ks = jax.random.split(key, 18)
    params = {}
    branch_w, branch_b = [], []
    for i in range(N_BRANCH):
        branch_w.append(jax.random.normal(ks[2 * i], (HIDDEN, 1), jnp.float32) * 0.1)
        branch_b.append(jax.random.normal(ks[2 * i + 1], (HIDDEN,), jnp.float32) * 0.1)
    params["branch_w"] = branch_w
    params["branch_b"] = branch_b
    params["fc1_w"] = jax.random.normal(ks[14], (HIDDEN, CONCAT), jnp.float32) * 0.05
    params["fc1_b"] = jax.random.normal(ks[15], (HIDDEN,), jnp.float32) * 0.05
    params["fc2_w"] = jax.random.normal(ks[16], (output_dim, HIDDEN), jnp.float32) * 0.05
    params["fc2_b"] = jax.random.normal(ks[17], (output_dim,), jnp.float32) * 0.05
    return params


def prepare_params(params, matmul_dtype=jnp.bfloat16):
    """Fuse / pad / transpose weights once. Returns a dict of device arrays."""
    out_dim = params["fc2_w"].shape[0]
    out_p8 = _round_up(out_dim, SUBLANE)

    w_br = jnp.zeros((N_BRANCH_PAD, HIDDEN), jnp.float32)
    b_br = jnp.zeros((N_BRANCH_PAD, HIDDEN), jnp.float32)
    for k in range(N_BRANCH):
        w_br = w_br.at[k].set(params["branch_w"][k][:, 0])
        b_br = b_br.at[k].set(params["branch_b"][k])

    w1 = jnp.zeros((K_PAD, HIDDEN), jnp.float32)
    w1 = w1.at[:CONCAT, :].set(params["fc1_w"].T)          # zero rows for pad slot
    b1 = params["fc1_b"][None, :].astype(jnp.float32)

    w2 = jnp.zeros((out_p8, HIDDEN), jnp.float32)
    w2 = w2.at[:out_dim, :].set(params["fc2_w"])           # PyTorch layout [out, 64]
    b2 = jnp.zeros((out_p8, 1), jnp.float32).at[:out_dim, 0].set(params["fc2_b"])

    return {
        "w_br": w_br, "b_br": b_br,
        "w1": w1.astype(matmul_dtype), "b1": b1,
        "w2": w2.astype(matmul_dtype), "b2": b2,
    }


# ----------------------------------------------------------------------------
# Forward pass (jitted; only input stacking + kernel launch per call)
# ----------------------------------------------------------------------------
@partial(jax.jit, static_argnames=("out_dim", "tm_max"))
def mlp7_forward(weights, A, B, C, D, E, F, G, H, I, *, out_dim,
                 tm_max=TILE_M_MAX):
    del A, B  # unused by the PyTorch module
    batch = C.shape[0]
    out_p8 = weights["w2"].shape[0]

    # Stack scalars -> [B, 7], pad to a lane-friendly [padded, 8].
    x7 = jnp.concatenate([C, D, E, F, G, H, I], axis=1).astype(jnp.float32)

    # Balanced batch tiling: >= 2 equal steps once batch >= 256 (feeds both
    # v7x TensorCores), tm a multiple of 128 so output stores stay lane-dense.
    n_steps = _cdiv(batch, tm_max)
    if n_steps == 1 and batch >= 2 * LANE:
        n_steps = 2
    tm = _round_up(_cdiv(batch, n_steps), LANE)
    padded = n_steps * tm

    x8 = jnp.zeros((padded, N_BRANCH_PAD), jnp.float32).at[:batch, :N_BRANCH].set(x7)

    const = lambda i: (0, 0)   # weights stay VMEM-resident across grid steps

    out_t = pl.pallas_call(
        _mlp7_kernel,
        out_shape=jax.ShapeDtypeStruct((out_p8, padded), jnp.float32),
        grid=(n_steps,),
        in_specs=[
            pl.BlockSpec((tm, N_BRANCH_PAD), lambda i: (i, 0)),   # x tile
            pl.BlockSpec((N_BRANCH_PAD, HIDDEN), const),          # branch W
            pl.BlockSpec((N_BRANCH_PAD, HIDDEN), const),          # branch b
            pl.BlockSpec((K_PAD, HIDDEN), const),                 # fc1 W^T (padded)
            pl.BlockSpec((1, HIDDEN), const),                     # fc1 b
            pl.BlockSpec((out_p8, HIDDEN), const),                # fc2 W (padded)
            pl.BlockSpec((out_p8, 1), const),                     # fc2 b
        ],
        out_specs=pl.BlockSpec((out_p8, tm), lambda i: (0, i)),   # transposed output
        compiler_params=pltpu.CompilerParams(
            dimension_semantics=("parallel",),
            vmem_limit_bytes=32 * 1024 * 1024),
    )(x8, weights["w_br"], weights["b_br"], weights["w1"], weights["b1"],
      weights["w2"], weights["b2"])

    return out_t[:out_dim, :batch].T


# ----------------------------------------------------------------------------
# Pure-JAX reference matching the PyTorch forward exactly
# ----------------------------------------------------------------------------
def mlp7_reference(params, A, B, C, D, E, F, G, H, I):
    del A, B
    scalars = [C, D, E, F, G, H, I]
    outs = []
    for k, s in enumerate(scalars):
        w = params["branch_w"][k]          # [64, 1]
        b = params["branch_b"][k]          # [64]
        outs.append(jnp.maximum(s @ w.T + b, 0.0))
    x_all = jnp.concatenate(outs, axis=1)  # [B, 448]
    x = jnp.maximum(x_all @ params["fc1_w"].T + params["fc1_b"], 0.0)
    return x @ params["fc2_w"].T + params["fc2_b"]


if __name__ == "__main__":
    output_dim = 8
    key = jax.random.PRNGKey(0)
    pkey, dkey = jax.random.split(key)
    raw_params = init_params(pkey, output_dim)

    # One-time weight preparation (hoisted out of the per-call path).
    weights_f32 = prepare_params(raw_params, matmul_dtype=jnp.float32)
    weights_bf16 = prepare_params(raw_params, matmul_dtype=jnp.bfloat16)

    for batch in (8, 600):   # small case + a case exercising grid>1 / padding
        dkeys = jax.random.split(jax.random.fold_in(dkey, batch), 9)
        inputs = [jax.random.normal(dkeys[i], (batch, 1), jnp.float32)
                  for i in range(9)]
        ref = mlp7_reference(raw_params, *inputs)

        # f32 matmul path: tight check of exact forward semantics.
        out_f32 = jax.block_until_ready(
            mlp7_forward(weights_f32, *inputs, out_dim=output_dim))
        assert out_f32.shape == (batch, output_dim)
        assert jnp.allclose(out_f32, ref, atol=1e-4, rtol=1e-4), \
            f"f32 mismatch vs reference (batch={batch})"

        # bf16 matmul operands (MXU fast path on all generations), f32 accumulation.
        out_bf16 = jax.block_until_ready(
            mlp7_forward(weights_bf16, *inputs, out_dim=output_dim))
        assert out_bf16.shape == (batch, output_dim)
        assert jnp.allclose(out_bf16, ref, atol=3e-2, rtol=3e-2), \
            f"bf16 mismatch vs reference (batch={batch})"

    print("KERNEL_OK")
</pallas_src>

<mosaic_0001>
module attributes {stable_mosaic.version = 11 : i64} {
  func.func @_mlp7_kernel(%arg0: i32, %arg1: memref<128x8xf32, #tpu.memory_space<vmem>>, %arg2: memref<8x64xf32, #tpu.memory_space<vmem>>, %arg3: memref<8x64xf32, #tpu.memory_space<vmem>>, %arg4: memref<512x64xf32, #tpu.memory_space<vmem>>, %arg5: memref<1x64xf32, #tpu.memory_space<vmem>>, %arg6: memref<8x64xf32, #tpu.memory_space<vmem>>, %arg7: memref<8x1xf32, #tpu.memory_space<vmem>>, %arg8: memref<8x128xf32, #tpu.memory_space<vmem>>) attributes {dimension_semantics = [#tpu.dimension_semantics<parallel>], iteration_bounds = array<i64: 1>, scalar_prefetch = 0 : i64, scratch_operands = 0 : i64, tpu.core_type = #tpu.core_type<tc>, window_params = [{transform_indices = @transform_0, window_bounds = array<i64: 128, 8>}, {pipeline_mode = #tpu.pipeline_mode<synchronous>, transform_indices = @transform_1, window_bounds = array<i64: 8, 64>}, {pipeline_mode = #tpu.pipeline_mode<synchronous>, transform_indices = @transform_2, window_bounds = array<i64: 8, 64>}, {pipeline_mode = #tpu.pipeline_mode<synchronous>, transform_indices = @transform_3, window_bounds = array<i64: 512, 64>}, {pipeline_mode = #tpu.pipeline_mode<synchronous>, transform_indices = @transform_4, window_bounds = array<i64: 1, 64>}, {pipeline_mode = #tpu.pipeline_mode<synchronous>, transform_indices = @transform_5, window_bounds = array<i64: 8, 64>}, {pipeline_mode = #tpu.pipeline_mode<synchronous>, transform_indices = @transform_6, window_bounds = array<i64: 8, 1>}, {transform_indices = @transform_7, window_bounds = array<i64: 8, 128>}]} {
    %c0 = arith.constant 0 : index
    %c0_0 = arith.constant 0 : index
    %0 = vector.load %arg1[%c0, %c0_0] : memref<128x8xf32, #tpu.memory_space<vmem>>, vector<128x8xf32>
    %1 = vector.extract_strided_slice %0 {offsets = [0, 0], sizes = [128, 1], strides = [1, 1]} : vector<128x8xf32> to vector<128x1xf32>
    %c0_1 = arith.constant 0 : index
    %c0_2 = arith.constant 0 : index
    %2 = vector.load %arg2[%c0_1, %c0_2] : memref<8x64xf32, #tpu.memory_space<vmem>>, vector<1x64xf32>
    %3 = vector.broadcast %1 : vector<128x1xf32> to vector<128x64xf32>
    %4 = vector.broadcast %2 : vector<1x64xf32> to vector<128x64xf32>
    %5 = arith.mulf %3, %4 : vector<128x64xf32>
    %c0_3 = arith.constant 0 : index
    %c0_4 = arith.constant 0 : index
    %6 = vector.load %arg3[%c0_3, %c0_4] : memref<8x64xf32, #tpu.memory_space<vmem>>, vector<1x64xf32>
    %7 = vector.broadcast %6 : vector<1x64xf32> to vector<128x64xf32>
    %8 = arith.addf %5, %7 : vector<128x64xf32>
    %cst = arith.constant 0.000000e+00 : f32
    %9 = vector.broadcast %cst : f32 to vector<128x64xf32>
    %10 = arith.maximumf %8, %9 : vector<128x64xf32>
    %11 = vector.extract_strided_slice %0 {offsets = [0, 1], sizes = [128, 1], strides = [1, 1]} : vector<128x8xf32> to vector<128x1xf32>
    %c1 = arith.constant 1 : index
    %c0_5 = arith.constant 0 : index
    %12 = vector.load %arg2[%c1, %c0_5] : memref<8x64xf32, #tpu.memory_space<vmem>>, vector<1x64xf32>
    %13 = vector.broadcast %11 : vector<128x1xf32> to vector<128x64xf32>
    %14 = vector.broadcast %12 : vector<1x64xf32> to vector<128x64xf32>
    %15 = arith.mulf %13, %14 : vector<128x64xf32>
    %c1_6 = arith.constant 1 : index
    %c0_7 = arith.constant 0 : index
    %16 = vector.load %arg3[%c1_6, %c0_7] : memref<8x64xf32, #tpu.memory_space<vmem>>, vector<1x64xf32>
    %17 = vector.broadcast %16 : vector<1x64xf32> to vector<128x64xf32>
    %18 = arith.addf %15, %17 : vector<128x64xf32>
    %cst_8 = arith.constant 0.000000e+00 : f32
    %19 = vector.broadcast %cst_8 : f32 to vector<128x64xf32>
    %20 = arith.maximumf %18, %19 : vector<128x64xf32>
    %21 = vector.extract_strided_slice %0 {offsets = [0, 2], sizes = [128, 1], strides = [1, 1]} : vector<128x8xf32> to vector<128x1xf32>
    %c2 = arith.constant 2 : index
    %c0_9 = arith.constant 0 : index
    %22 = vector.load %arg2[%c2, %c0_9] : memref<8x64xf32, #tpu.memory_space<vmem>>, vector<1x64xf32>
    %23 = vector.broadcast %21 : vector<128x1xf32> to vector<128x64xf32>
    %24 = vector.broadcast %22 : vector<1x64xf32> to vector<128x64xf32>
    %25 = arith.mulf %23, %24 : vector<128x64xf32>
    %c2_10 = arith.constant 2 : index
    %c0_11 = arith.constant 0 : index
    %26 = vector.load %arg3[%c2_10, %c0_11] : memref<8x64xf32, #tpu.memory_space<vmem>>, vector<1x64xf32>
    %27 = vector.broadcast %26 : vector<1x64xf32> to vector<128x64xf32>
    %28 = arith.addf %25, %27 : vector<128x64xf32>
    %cst_12 = arith.constant 0.000000e+00 : f32
    %29 = vector.broadcast %cst_12 : f32 to vector<128x64xf32>
    %30 = arith.maximumf %28, %29 : vector<128x64xf32>
    %31 = vector.extract_strided_slice %0 {offsets = [0, 3], sizes = [128, 1], strides = [1, 1]} : vector<128x8xf32> to vector<128x1xf32>
    %c3 = arith.constant 3 : index
    %c0_13 = arith.constant 0 : index
    %32 = vector.load %arg2[%c3, %c0_13] : memref<8x64xf32, #tpu.memory_space<vmem>>, vector<1x64xf32>
    %33 = vector.broadcast %31 : vector<128x1xf32> to vector<128x64xf32>
    %34 = vector.broadcast %32 : vector<1x64xf32> to vector<128x64xf32>
    %35 = arith.mulf %33, %34 : vector<128x64xf32>
    %c3_14 = arith.constant 3 : index
    %c0_15 = arith.constant 0 : index
    %36 = vector.load %arg3[%c3_14, %c0_15] : memref<8x64xf32, #tpu.memory_space<vmem>>, vector<1x64xf32>
    %37 = vector.broadcast %36 : vector<1x64xf32> to vector<128x64xf32>
    %38 = arith.addf %35, %37 : vector<128x64xf32>
    %cst_16 = arith.constant 0.000000e+00 : f32
    %39 = vector.broadcast %cst_16 : f32 to vector<128x64xf32>
    %40 = arith.maximumf %38, %39 : vector<128x64xf32>
    %41 = tpu.concatenate %10, %20, %30, %40 in 1 : vector<128x64xf32>, vector<128x64xf32>, vector<128x64xf32>, vector<128x64xf32> -> vector<128x256xf32>
    %42 = vector.extract_strided_slice %0 {offsets = [0, 4], sizes = [128, 1], strides = [1, 1]} : vector<128x8xf32> to vector<128x1xf32>
    %c4 = arith.constant 4 : index
    %c0_17 = arith.constant 0 : index
    %43 = vector.load %arg2[%c4, %c0_17] : memref<8x64xf32, #tpu.memory_space<vmem>>, vector<1x64xf32>
    %44 = vector.broadcast %42 : vector<128x1xf32> to vector<128x64xf32>
    %45 = vector.broadcast %43 : vector<1x64xf32> to vector<128x64xf32>
    %46 = arith.mulf %44, %45 : vector<128x64xf32>
    %c4_18 = arith.constant 4 : index
    %c0_19 = arith.constant 0 : index
    %47 = vector.load %arg3[%c4_18, %c0_19] : memref<8x64xf32, #tpu.memory_space<vmem>>, vector<1x64xf32>
    %48 = vector.broadcast %47 : vector<1x64xf32> to vector<128x64xf32>
    %49 = arith.addf %46, %48 : vector<128x64xf32>
    %cst_20 = arith.constant 0.000000e+00 : f32
    %50 = vector.broadcast %cst_20 : f32 to vector<128x64xf32>
    %51 = arith.maximumf %49, %50 : vector<128x64xf32>
    %52 = vector.extract_strided_slice %0 {offsets = [0, 5], sizes = [128, 1], strides = [1, 1]} : vector<128x8xf32> to vector<128x1xf32>
    %c5 = arith.constant 5 : index
    %c0_21 = arith.constant 0 : index
    %53 = vector.load %arg2[%c5, %c0_21] : memref<8x64xf32, #tpu.memory_space<vmem>>, vector<1x64xf32>
    %54 = vector.broadcast %52 : vector<128x1xf32> to vector<128x64xf32>
    %55 = vector.broadcast %53 : vector<1x64xf32> to vector<128x64xf32>
    %56 = arith.mulf %54, %55 : vector<128x64xf32>
    %c5_22 = arith.constant 5 : index
    %c0_23 = arith.constant 0 : index
    %57 = vector.load %arg3[%c5_22, %c0_23] : memref<8x64xf32, #tpu.memory_space<vmem>>, vector<1x64xf32>
    %58 = vector.broadcast %57 : vector<1x64xf32> to vector<128x64xf32>
    %59 = arith.addf %56, %58 : vector<128x64xf32>
    %cst_24 = arith.constant 0.000000e+00 : f32
    %60 = vector.broadcast %cst_24 : f32 to vector<128x64xf32>
    %61 = arith.maximumf %59, %60 : vector<128x64xf32>
    %62 = vector.extract_strided_slice %0 {offsets = [0, 6], sizes = [128, 1], strides = [1, 1]} : vector<128x8xf32> to vector<128x1xf32>
    %c6 = arith.constant 6 : index
    %c0_25 = arith.constant 0 : index
    %63 = vector.load %arg2[%c6, %c0_25] : memref<8x64xf32, #tpu.memory_space<vmem>>, vector<1x64xf32>
    %64 = vector.broadcast %62 : vector<128x1xf32> to vector<128x64xf32>
    %65 = vector.broadcast %63 : vector<1x64xf32> to vector<128x64xf32>
    %66 = arith.mulf %64, %65 : vector<128x64xf32>
    %c6_26 = arith.constant 6 : index
    %c0_27 = arith.constant 0 : index
    %67 = vector.load %arg3[%c6_26, %c0_27] : memref<8x64xf32, #tpu.memory_space<vmem>>, vector<1x64xf32>
    %68 = vector.broadcast %67 : vector<1x64xf32> to vector<128x64xf32>
    %69 = arith.addf %66, %68 : vector<128x64xf32>
    %cst_28 = arith.constant 0.000000e+00 : f32
    %70 = vector.broadcast %cst_28 : f32 to vector<128x64xf32>
    %71 = arith.maximumf %69, %70 : vector<128x64xf32>
    %cst_29 = arith.constant 0.000000e+00 : f32
    %72 = vector.broadcast %cst_29 : f32 to vector<128x64xf32>
    %73 = tpu.concatenate %51, %61, %71, %72 in 1 : vector<128x64xf32>, vector<128x64xf32>, vector<128x64xf32>, vector<128x64xf32> -> vector<128x256xf32>
    %c0_30 = arith.constant 0 : index
    %c0_31 = arith.constant 0 : index
    %74 = vector.load %arg4[%c0_30, %c0_31] : memref<512x64xf32, #tpu.memory_space<vmem>>, vector<256x64xf32>
    %cst_32 = arith.constant dense<0.000000e+00> : vector<128x64xf32>
    %75 = tpu.matmul %41, %74, %cst_32 {dimension_numbers = #tpu.dot_dimension_numbers<[1], [0], [0], [1], [0, 0, 1, 1], [], []>} : vector<128x256xf32>, vector<256x64xf32>, vector<128x64xf32> -> vector<128x64xf32>
    %c256 = arith.constant 256 : index
    %c0_33 = arith.constant 0 : index
    %76 = vector.load %arg4[%c256, %c0_33] : memref<512x64xf32, #tpu.memory_space<vmem>>, vector<256x64xf32>
    %cst_34 = arith.constant dense<0.000000e+00> : vector<128x64xf32>
    %77 = tpu.matmul %73, %76, %cst_34 {dimension_numbers = #tpu.dot_dimension_numbers<[1], [0], [0], [1], [0, 0, 1, 1], [], []>} : vector<128x256xf32>, vector<256x64xf32>, vector<128x64xf32> -> vector<128x64xf32>
    %78 = arith.addf %75, %77 : vector<128x64xf32>
    %c0_35 = arith.constant 0 : index
    %c0_36 = arith.constant 0 : index
    %79 = vector.load %arg5[%c0_35, %c0_36] : memref<1x64xf32, #tpu.memory_space<vmem>>, vector<1x64xf32>
    %80 = vector.broadcast %79 : vector<1x64xf32> to vector<128x64xf32>
    %81 = arith.addf %78, %80 : vector<128x64xf32>
    %cst_37 = arith.constant 0.000000e+00 : f32
    %82 = vector.broadcast %cst_37 : f32 to vector<128x64xf32>
    %83 = arith.maximumf %81, %82 : vector<128x64xf32>
    %c0_38 = arith.constant 0 : index
    %c0_39 = arith.constant 0 : index
    %84 = vector.load %arg6[%c0_38, %c0_39] : memref<8x64xf32, #tpu.memory_space<vmem>>, vector<8x64xf32>
    %cst_40 = arith.constant dense<0.000000e+00> : vector<8x128xf32>
    %85 = tpu.matmul %84, %83, %cst_40 {dimension_numbers = #tpu.dot_dimension_numbers<[1], [1], [0], [0], [0, 0, 1, 0], [], []>} : vector<8x64xf32>, vector<128x64xf32>, vector<8x128xf32> -> vector<8x128xf32>
    %c0_41 = arith.constant 0 : index
    %c0_42 = arith.constant 0 : index
    %86 = vector.load %arg7[%c0_41, %c0_42] : memref<8x1xf32, #tpu.memory_space<vmem>>, vector<8x1xf32>
    %87 = vector.broadcast %86 : vector<8x1xf32> to vector<8x128xf32>
    %88 = arith.addf %85, %87 : vector<8x128xf32>
    %c0_43 = arith.constant 0 : index
    %c0_44 = arith.constant 0 : index
    %89 = vector.load %arg8[%c0_43, %c0_44] : memref<8x128xf32, #tpu.memory_space<vmem>>, vector<8x128xf32>
    tpu.vector_store %arg8[%c0_43, %c0_44], %88 {strides = array<i32>} : memref<8x128xf32, #tpu.memory_space<vmem>>, vector<8x128xf32>,
    return
  }
  func.func @transform_0(%arg0: i32) -> (i32, i32) {
    %c0_i32 = arith.constant 0 : i32
    %c0_i32_0 = arith.constant 0 : i32
    return %arg0, %c0_i32 : i32, i32
  }
  func.func @transform_1(%arg0: i32) -> (i32, i32) {
    %c0_i32 = arith.constant 0 : i32
    %c0_i32_0 = arith.constant 0 : i32
    %c0_i32_1 = arith.constant 0 : i32
    return %c0_i32, %c0_i32_0 : i32, i32
  }
  func.func @transform_2(%arg0: i32) -> (i32, i32) {
    %c0_i32 = arith.constant 0 : i32
    %c0_i32_0 = arith.constant 0 : i32
    %c0_i32_1 = arith.constant 0 : i32
    return %c0_i32, %c0_i32_0 : i32, i32
  }
  func.func @transform_3(%arg0: i32) -> (i32, i32) {
    %c0_i32 = arith.constant 0 : i32
    %c0_i32_0 = arith.constant 0 : i32
    %c0_i32_1 = arith.constant 0 : i32
    return %c0_i32, %c0_i32_0 : i32, i32
  }
  func.func @transform_4(%arg0: i32) -> (i32, i32) {
    %c0_i32 = arith.constant 0 : i32
    %c0_i32_0 = arith.constant 0 : i32
    %c0_i32_1 = arith.constant 0 : i32
    return %c0_i32, %c0_i32_0 : i32, i32
  }
  func.func @transform_5(%arg0: i32) -> (i32, i32) {
    %c0_i32 = arith.constant 0 : i32
    %c0_i32_0 = arith.constant 0 : i32
    %c0_i32_1 = arith.constant 0 : i32
    return %c0_i32, %c0_i32_0 : i32, i32
  }
  func.func @transform_6(%arg0: i32) -> (i32, i32) {
    %c0_i32 = arith.constant 0 : i32
    %c0_i32_0 = arith.constant 0 : i32
    %c0_i32_1 = arith.constant 0 : i32
    return %c0_i32, %c0_i32_0 : i32, i32
  }
  func.func @transform_7(%arg0: i32) -> (i32, i32) {
    %c0_i32 = arith.constant 0 : i32
    %c0_i32_0 = arith.constant 0 : i32
    return %c0_i32, %arg0 : i32, i32
  }
}

</mosaic_0001>

<bundles_post_ra>
// kernel: mlp7_forward.1
= control target key start
LH: loop header
LB: loop body
LE: loop exit
PB: predicated region body
PF: predicated region fallthrough
CT: control target
= control target key end

     0   :  { %v2267_v0 = vmov 5   ;;  %v2268_v1 = vmov 3   ;;  %v2269_v6 = vmov 1   ;;  %v2270_v19 = vmov 0   ;;  %s2274_s18 = smov 64   ;;  %s3499_s0 = inlined_call_operand.vmem [shape: f32[128,8], index: 0, kind: input, shape index: {}]   ;;  %s3500_s1 = inlined_call_operand.vmem [shape: f32[8,64], index: 1, kind: input, shape index: {}]   ;;  %s3501_s2 = inlined_call_operand.vmem [shape: f32[8,64], index: 2, kind: input, shape index: {}]   ;;  %s3502_s3 = inlined_call_operand.vmem [shape: f32[512,64], index: 3, kind: input, shape index: {}]   ;;  %s3503_s4 = inlined_call_operand.vmem [shape: f32[1,64], index: 4, kind: input, shape index: {}]   ;;  %s3504_s6 = inlined_call_operand.vmem [shape: f32[8,1], index: 6, kind: input, shape index: {}]   ;;  %s3505_s5 = inlined_call_operand.vmem [shape: f32[8,64], index: 5, kind: input, shape index: {}]   ;;  %s3506_s7 = inlined_call_operand.vmem [shape: f32[8,128], index: 7, kind: output, shape index: {}]  }
   0x1   :  { %2063 = vset.pattern.permute.xlu1 %v2267_v0  ;;  %2062 = vset.pattern.permute.xlu0 %v2268_v1  ;;  %v2323_v2 = vld [vmem:[%s3499_s0] sm:$0xff]  ;;  %v2330_v3 = vld [vmem:[%s3499_s0 + $0x28] sm:$0xff]  ;;  %v2343_v5 = vld [vmem:[%s3499_s0 + $0x30] sm:$0xff]  ;;  %v2271_v20 = vmov 4   ;;  %v2272_v36 = vmov 2   ;;  %v2273_v49 = vmov 6  }
   0x2   :  { %831 = vperm.xlu1 %2063, %v2323_v2   ;;  %426 = vperm.xlu0 %2062, %v2323_v2   ;;  %v2335_v4 = vld [vmem:[%s3499_s0 + $0x8] sm:$0xff]  ;;  %v2350_v7 = vld [vmem:[%s3499_s0 + $0x50] sm:$0xff]  ;;  %v2362_v9 = vld [vmem:[%s3499_s0 + $0x58] sm:$0xff]  ;;  %vm674_vm0 = vcmask 523264   ;;  %vm2276_vm2 = vmmov 0  }
   0x3   :  { %v2357_v8 = vld [vmem:[%s3499_s0 + $0x10] sm:$0xff]  ;;  %v2374_v10 = vld [vmem:[%s3499_s0 + $0x18] sm:$0xff]  ;;  %v2382_v11 = vld [vmem:[%s3499_s0 + $0x20] sm:$0xff] }
   0x4   :  { %v2390_v12 = vld [vmem:[%s3499_s0 + $0x40] sm:$0xff]  ;;  %v2397_v13 = vld [vmem:[%s3499_s0 + $0x48] sm:$0xff]  ;;  %v2412_v15 = vld [vmem:[%s3499_s0 + $0x70] sm:$0xff] }
   0x5   :  { %v2404_v14 = vld [vmem:[%s3499_s0 + $0x68] sm:$0xff]  ;;  %v2427_v16 = vld [vmem:[%s3499_s0 + $0x38] sm:$0xff]  ;;  %v2439_v17 = vld [vmem:[%s3499_s0 + $0x60] sm:$0xff] }
   0x6   :  { %2064 = vset.pattern.permute.xlu1 %v2268_v1  ;;  %446 = vperm.xlu0 %2062, %v2330_v3   ;;  %v2447_v18 = vld [vmem:[%s3499_s0 + $0x78] sm:$0xff]  ;;  %v2508_v32 = vld [vmem:[%s3500_s1 + $0x1] ss:$0 sm:$0xff]  ;;  %v2526_v40 = vld [vmem:[%s3500_s1 + $0x5] ss:$0 sm:$0xff] }
   0x7   :  { %430 = vperm.xlu1 %2064, %v2335_v4   ;;  %v2517_v37 = vld [vmem:[%s3501_s2 + $0x1] ss:$0 sm:$0xff]  ;;  %v2532_v43 = vld [vmem:[%s3501_s2 + $0x5] ss:$0 sm:$0xff]  ;;  %v2560_v56 = vld [vmem:[%s3500_s1 + $0x3] ss:$0 sm:$0xff] }
   0x8   :  { %v2571_v61 = vld [vmem:[%s3501_s2 + $0x3] ss:$0 sm:$0xff]  ;;  %vm3448_vm1 = vmpackc.low %vm674_vm0, %vm674_vm0 }
   0xa   :  { %450 = vperm.xlu0 %2062, %v2343_v5  }
   0xb   :  { %2065 = vset.pattern.permute.xlu1 %v2269_v6 }
   0xc   :  { %186 = vperm.xlu1 %2065, %v2335_v4  }
   0xe   :  { %466 = vperm.xlu0 %2062, %v2350_v7  }
  0x10   :  { %2066 = vset.pattern.permute.xlu1 %v2268_v1 }
  0x11   :  { %434 = vperm.xlu1 %2066, %v2357_v8  }
  0x12   :  { %470 = vperm.xlu0 %2062, %v2362_v9  }
  0x15   :  { %2067 = vset.pattern.permute.xlu1 %v2269_v6 }
  0x16   :  { %190 = vperm.xlu1 %2067, %v2357_v8   ;;  %2083 = vset.pattern.permute.xlu0 %v2269_v6 }
  0x17   :  { %182 = vperm.xlu0 %2083, %v2323_v2  }
  0x1a   :  { %2068 = vset.pattern.permute.xlu1 %v2268_v1 }
  0x1b   :  { %438 = vperm.xlu1 %2068, %v2374_v10   ;;  %194 = vperm.xlu0 %2083, %v2374_v10  }
  0x1f   :  { %2069 = vset.pattern.permute.xlu1 %v2267_v0  ;;  %198 = vperm.xlu0 %2083, %v2382_v11  }
  0x20   :  { %843 = vperm.xlu1 %2069, %v2374_v10  }
  0x23   :  { %214 = vperm.xlu0 %2083, %v2390_v12  }
  0x24   :  { %2070 = vset.pattern.permute.xlu1 %v2268_v1 }
  0x25   :  { %442 = vperm.xlu1 %2070, %v2382_v11  }
  0x27   :  { %218 = vperm.xlu0 %2083, %v2397_v13  }
  0x29   :  { %2071 = vset.pattern.permute.xlu1 %v2267_v0 }
  0x2a   :  { %847 = vperm.xlu1 %2071, %v2382_v11  }
  0x2b   :  { %234 = vperm.xlu0 %2083, %v2404_v14  }
  0x2e   :  { %2072 = vset.pattern.permute.xlu1 %v2269_v6 }
  0x2f   :  { %202 = vperm.xlu1 %2072, %v2330_v3   ;;  %238 = vperm.xlu0 %2083, %v2412_v15  }
  0x33   :  { %2073 = vset.pattern.permute.xlu1 %v2267_v0  ;;  %2090 = vset.pattern.permute.xlu0 %v2267_v0 }
  0x34   :  { %851 = vperm.xlu1 %2073, %v2330_v3   ;;  %835 = vperm.xlu0 %2090, %v2335_v4  }
  0x38   :  { %2074 = vset.pattern.permute.xlu1 %v2269_v6  ;;  %839 = vperm.xlu0 %2090, %v2357_v8  }
  0x39   :  { %206 = vperm.xlu1 %2074, %v2343_v5  }
  0x3c   :  { %855 = vperm.xlu0 %2090, %v2343_v5  }
  0x3d   :  { %2075 = vset.pattern.permute.xlu1 %v2268_v1 }
  0x3e   :  { %454 = vperm.xlu1 %2075, %v2427_v16  }
  0x40   :  { %859 = vperm.xlu0 %2090, %v2427_v16  }
  0x42   :  { %2076 = vset.pattern.permute.xlu1 %v2269_v6 }
  0x43   :  { %210 = vperm.xlu1 %2076, %v2427_v16  }
  0x44   :  { %875 = vperm.xlu0 %2090, %v2362_v9  }
  0x47   :  { %2077 = vset.pattern.permute.xlu1 %v2268_v1 }
  0x48   :  { %458 = vperm.xlu1 %2077, %v2390_v12   ;;  %879 = vperm.xlu0 %2090, %v2439_v17  }
  0x4c   :  { %2078 = vset.pattern.permute.xlu1 %v2267_v0  ;;  %891 = vperm.xlu0 %2090, %v2447_v18  }
  0x4d   :  { %863 = vperm.xlu1 %2078, %v2390_v12  }
  0x50   :  { %2100 = vset.pattern.permute.xlu0 %v2270_v19 }
  0x51   :  { %2079 = vset.pattern.permute.xlu1 %v2268_v1  ;;  %55 = vperm.xlu0 %2100, %v2357_v8  }
  0x52   :  { %462 = vperm.xlu1 %2079, %v2397_v13  }
  0x55   :  { %2101 = vset.pattern.permute.xlu0 %v2271_v20 }
  0x56   :  { %2080 = vset.pattern.permute.xlu1 %v2267_v0  ;;  %713 = vperm.xlu0 %2101, %v2335_v4  }
  0x57   :  { %867 = vperm.xlu1 %2080, %v2397_v13  }
  0x5a   :  { %721 = vperm.xlu0 %2101, %v2374_v10  }
  0x5b   :  { %2081 = vset.pattern.permute.xlu1 %v2269_v6 }
  0x5c   :  { %222 = vperm.xlu1 %2081, %v2350_v7  }
  0x60   :  { %2082 = vset.pattern.permute.xlu1 %v2267_v0 }
  0x61   :  { %871 = vperm.xlu1 %2082, %v2350_v7  }
  0x65   :  { %2084 = vset.pattern.permute.xlu1 %v2269_v6 }
  0x66   :  { %226 = vperm.xlu1 %2084, %v2362_v9  }
  0x6a   :  { %2085 = vset.pattern.permute.xlu1 %v2268_v1 }
  0x6b   :  { %474 = vperm.xlu1 %2085, %v2439_v17  }
  0x6f   :  { %2086 = vset.pattern.permute.xlu1 %v2269_v6 }
  0x70   :  { %230 = vperm.xlu1 %2086, %v2439_v17  }
  0x74   :  { %2087 = vset.pattern.permute.xlu1 %v2268_v1 }
  0x75   :  { %478 = vperm.xlu1 %2087, %v2404_v14  }
  0x79   :  { %2088 = vset.pattern.permute.xlu1 %v2267_v0 }
  0x7a   :  { %883 = vperm.xlu1 %2088, %v2404_v14  }
  0x7e   :  { %2089 = vset.pattern.permute.xlu1 %v2268_v1 }
  0x7f   :  { %482 = vperm.xlu1 %2089, %v2412_v15  }
  0x81   :  { %v2477_v21 = vpop.permute.xlu1 %831  ;;  %v427_v22 = vpop.permute.xlu0 %426 }
  0x82   :  { %v493_v57 = vmul.f32 %v2560_v56, %v427_v22 }
  0x83   :  { %2091 = vset.pattern.permute.xlu1 %v2267_v0 }
  0x84   :  { %887 = vperm.xlu1 %2091, %v2412_v15   ;;  %v514_v62 = vadd.f32 %v2571_v61, %v493_v57 }
  0x85   :  { %v2481_v23 = vpop.permute.xlu0 %446 }
  0x86   :  { %v2483_v24 = vpop.permute.xlu1 %430 }
  0x88   :  { %2092 = vset.pattern.permute.xlu1 %v2270_v19 }
  0x89   :  { %45 = vperm.xlu1 %2092, %v2323_v2   ;;  %v2487_v25 = vpop.permute.xlu0 %450 }
  0x8b   :  { %v2489_v26 = vpop.permute.xlu1 %186 }
  0x8d   :  { %2093 = vset.pattern.permute.xlu1 %v2271_v20  ;;  %v2492_v27 = vpop.permute.xlu0 %466 }
  0x8e   :  { %709 = vperm.xlu1 %2093, %v2323_v2  }
  0x90   :  { %v2495_v28 = vpop.permute.xlu1 %434 }
  0x91   :  { %v2497_v29 = vpop.permute.xlu0 %470 }
  0x92   :  { %2094 = vset.pattern.permute.xlu1 %v2268_v1 }
  0x93   :  { %486 = vperm.xlu1 %2094, %v2447_v18  }
  0x95   :  { %v2501_v30 = vpop.permute.xlu1 %190 }
  0x96   :  { %v183_v31 = vpop.permute.xlu0 %182 }
  0x97   :  { %2095 = vset.pattern.permute.xlu1 %v2269_v6  ;;  %v249_v58 = vmul.f32 %v2508_v32, %v183_v31  ;;  %v494_v6 = vmul.f32 %v2560_v56, %v2483_v24  ;;  %v1185_v31 = vld [vmem:[%s3502_s3 + $0x80] sm:$0xff]  ;;  %v1170_v24 = vld [vmem:[%s3502_s3 + $0x8] sm:$0xff] }
  0x98   :  { %242 = vperm.xlu1 %2095, %v2447_v18  }
  0x99   :  { %v270_v63 = vadd.f32 %v2517_v37, %v249_v58  ;;  %v1171_v58 = vld [vmem:[%s3502_s3 + $0x10] sm:$0xff] }
  0x9a   :  { %v2510_v33 = vpop.permute.xlu1 %438  ;;  %v195_v34 = vpop.permute.xlu0 %194 }
  0x9b   :  { %v252_v35 = vmul.f32 %v2508_v32, %v195_v34  ;;  %v286_v22 = vmax.f32 %v270_v63, 0.0  ;;  %v1186_v34 = vld [vmem:[%s3502_s3 + $0x88] sm:$0xff] }
  0x9c   :  { %2096 = vset.pattern.permute.xlu1 %v2272_v36 }
  0x9d   :  { %308 = vperm.xlu1 %2096, %v2335_v4   ;;  %v273_v38 = vadd.f32 %v2517_v37, %v252_v35  ;;  %v1169_v35 = vld [vmem:[%s3502_s3] sm:$0xff] }
  0x9e   :  { %v2521_v39 = vpop.permute.xlu0 %198 }
  0x9f   :  { %v844_v41 = vpop.permute.xlu1 %843  ;;  %v289_v44 = vmax.f32 %v273_v38, 0.0  ;;  %v898_v38 = vmul.f32 %v2526_v40, %v2477_v21  ;;  %v1188_v21 = vld [vmem:[%s3502_s3 + $0x98] sm:$0xff] }
  0xa0   :  { %v901_v42 = vmul.f32 %v2526_v40, %v844_v41 }
  0xa1   :  { %2097 = vset.pattern.permute.xlu1 %v2270_v19  ;;  %v919_v63 = vadd.f32 %v2532_v43, %v898_v38 }
  0xa2   :  { %v922_v45 = vadd.f32 %v2532_v43, %v901_v42  ;;  %50 = vperm.xlu1 %2097, %v2335_v4   ;;  %v2537_v46 = vpop.permute.xlu0 %214  ;;  %v1989_v42 = vpack.c.bf16 %v1170_v24, %v1169_v35 }
  0xa4   :  { %v938_v47 = vmax.f32 %v922_v45, 0.0  ;;  %v2539_v48 = vpop.permute.xlu1 %442 }
  0xa6   :  { %2098 = vset.pattern.permute.xlu1 %v2273_v49  ;;  %v2542_v50 = vpop.permute.xlu0 %218  ;;  %v2138_v51 = vpack.i.bf16 %v938_v47, %v289_v44  ;;  %v515_v44 = vadd.f32 %v2571_v61, %v494_v6 }
  0xa7   :  { %957 = vperm.xlu1 %2098, %v2335_v4   ;;  %v530_v4 = vmax.f32 %v514_v62, 0.0  ;;  %v1172_v62 = vld [vmem:[%s3502_s3 + $0x18] sm:$0xff] }
  0xa8   :  { %2139 = vrot.lane.b32.xlu0 %v2138_v51, %s2274_s18  ;;  %v1187_v51 = vld [vmem:[%s3502_s3 + $0x90] sm:$0xff]  ;;  %v1993_v6 = vpack.c.bf16 %v1172_v62, %v1171_v58 }
  0xa9   :  { %v2546_v52 = vpop.permute.xlu1 %847  ;;  %v2105_v47 = vpack.i.bf16 %v286_v22, %v530_v4  ;;  %v1991_v57 = vpack.c.bf16 %v1188_v21, %v1187_v51 }
  0xaa   :  { %v2548_v53 = vpop.permute.xlu0 %234 }
  0xab   :  { %2099 = vset.pattern.permute.xlu1 %v2272_v36 }
  0xac   :  { %312 = vperm.xlu1 %2099, %v2357_v8   ;;  %737 = vperm.xlu0 %2101, %v2427_v16  }
  0xae   :  { %v2553_v54 = vpop.permute.xlu1 %202  ;;  %v2555_v55 = vpop.permute.xlu0 %238 }
  0xb0   :  { %2102 = vset.pattern.permute.xlu1 %v2271_v20 }
  0xb1   :  { %717 = vperm.xlu1 %2102, %v2357_v8  }
  0xb3   :  { %v2566_v59 = vpop.permute.xlu1 %851  ;;  %v836_v60 = vpop.permute.xlu0 %835 }
  0xb5   :  { %2103 = vset.pattern.permute.xlu1 %v2273_v49 }
  0xb6   :  { %961 = vperm.xlu1 %2103, %v2357_v8   ;;  %v1987_v8 = vpack.c.bf16 %v1186_v34, %v1185_v31  ;;  %v531_v31 = vmax.f32 %v515_v44, 0.0  ;;  %v1189_v34 = vld [vmem:[%s3502_s3 + $0xa0] sm:$0xff]  ;;  %v1174_v44 = vld [vmem:[%s3502_s3 + $0x28] sm:$0xff] }
  0xb7   :  { %v2577_v0 = vpop.permute.xlu0 %839 }
  0xb8   :  { %v2579_v1 = vpop.permute.xlu1 %206  ;;  %1988 = vmatprep.subr.bf16.mxu1 %v1987_v8  ;;  %v1190_v8 = vld [vmem:[%s3502_s3 + $0xa8] sm:$0xff] }
  0xb9   :  { %1990 = vmatpush3.bf16.msra.mxu1 %v1989_v42  ;;  %v1995_v38 = vpack.c.bf16 %v1190_v8, %v1189_v34  ;;  %v1173_v42 = vld [vmem:[%s3502_s3 + $0x20] sm:$0xff]  ;;  %v1175_v34 = vld [vmem:[%s3502_s3 + $0x30] sm:$0xff] }
  0xba   :  { %2104 = vset.pattern.permute.xlu1 %v2270_v19  ;;  %1992 = vmatprep.subr.bf16.mxu1 %v1991_v57  ;;  %v1997_v21 = vpack.c.bf16 %v1174_v44, %v1173_v42  ;;  %v1193_v42 = vld [vmem:[%s3502_s3 + $0xc0] sm:$0xff]  ;;  %v1194_v44 = vld [vmem:[%s3502_s3 + $0xc8] sm:$0xff] }
  0xbb   :  { %60 = vperm.xlu1 %2104, %v2374_v10   ;;  %v2599_v41 = vpop.permute.xlu0 %855 }
  0xbd   :  { %v2602_v45 = vpop.permute.xlu1 %454  ;;  %1994 = vmatpush3.bf16.msra.mxu1 %v1993_v6  ;;  %v1192_v6 = vld [vmem:[%s3502_s3 + $0xb8] sm:$0xff] }
  0xbe   :  { %1996 = vmatprep.subr.bf16.mxu1 %v1995_v38  ;;  %v250_v38 = vmul.f32 %v2508_v32, %v2489_v26  ;;  %v1177_v26 = vld [vmem:[%s3502_s3 + $0x40] sm:$0xff] }
  0xbf   :  { %2106 = vrot.lane.b32.xlu1 %v2105_v47, %s2274_s18  ;;  %v860_v4 = vpop.permute.xlu0 %859  ;;  %v935_v47 = vmax.f32 %v919_v63, 0.0  ;;  %v899_v63 = vmul.f32 %v2526_v40, %v836_v60 }
  0xc0   :  { %v905_v22 = vmul.f32 %v2526_v40, %v860_v4  ;;  %2110 = vset.pattern.permute.xlu1 %v2273_v49  ;;  %v1191_v4 = vld [vmem:[%s3502_s3 + $0xb0] sm:$0xff] }
  0xc1   :  { %v2111_v62 = vpack.i.bf16 %v531_v31, %v935_v47  ;;  %1998 = vmatpush3.bf16.msra.mxu1 %v1997_v21  ;;  %v1176_v31 = vld [vmem:[%s3502_s3 + $0x38] sm:$0xff]  ;;  %v920_v47 = vadd.f32 %v2532_v43, %v899_v63  ;;  %v1178_v21 = vld [vmem:[%s3502_s3 + $0x48] sm:$0xff]  ;;  %v1195_v63 = vld [vmem:[%s3502_s3 + $0xd0] sm:$0xff] }
  0xc2   :  { %v926_v35 = vadd.f32 %v2532_v43, %v905_v22  ;;  %v211_v24 = vpop.permute.xlu1 %210  ;;  %v1999_v22 = vpack.c.bf16 %v1192_v6, %v1191_v4  ;;  %v1217_v4 = vld [vmem:[%s3502_s3 + $0x180] sm:$0xff]  ;;  %v1218_v6 = vld [vmem:[%s3502_s3 + $0x188] sm:$0xff] }
  0xc3   :  { %v256_v51 = vmul.f32 %v2508_v32, %v211_v24  ;;  %965 = vperm.xlu1 %2110, %v2374_v10   ;;  %v2001_v24 = vpack.c.bf16 %v1176_v31, %v1175_v34  ;;  %v936_v34 = vmax.f32 %v920_v47, 0.0  ;;  %v1955_v31 = vpack.c.bf16 %v1218_v6, %v1217_v4  ;;  %v1220_v4 = vld [vmem:[%s3502_s3 + $0x198] sm:$0xff] }
  0xc4   :  { %v942_v57 = vmax.f32 %v926_v35, 0.0  ;;  %2000 = vmatprep.subr.bf16.mxu1 %v1999_v22  ;;  %v251_v22 = vmul.f32 %v2508_v32, %v2501_v30 }
  0xc5   :  { %v277_v58 = vadd.f32 %v2517_v37, %v256_v51  ;;  %2002 = vmatpush3.bf16.msra.mxu1 %v2001_v24  ;;  %v2003_v51 = vpack.c.bf16 %v1194_v44, %v1193_v42  ;;  %v1201_v24 = vld [vmem:[%s3502_s3 + $0x100] sm:$0xff]  ;;  %v1179_v42 = vld [vmem:[%s3502_s3 + $0x50] sm:$0xff]  ;;  %v1180_v44 = vld [vmem:[%s3502_s3 + $0x58] sm:$0xff]  ;;  %1956 = vmatprep.subr.bf16.mxu0 %v1955_v31 }
  0xc6   :  { %v1198_v31 = vld [vmem:[%s3502_s3 + $0xe8] sm:$0xff] }
  0xc7   :  { %v293_v8 = vmax.f32 %v277_v58, 0.0  ;;  %v2649_v35 = vpop.permute.xlu1 %458  ;;  %2112 = vrot.lane.b32.xlu1 %v2111_v62, %s2274_s18  ;;  %v271_v58 = vadd.f32 %v2517_v37, %v250_v38  ;;  %2004 = vmatprep.subr.bf16.mxu1 %v2003_v51  ;;  %v1202_v38 = vld [vmem:[%s3502_s3 + $0x108] sm:$0xff]  ;;  %v495_v51 = vmul.f32 %v2560_v56, %v2495_v28  ;;  %v1197_v28 = vld [vmem:[%s3502_s3 + $0xe0] sm:$0xff] }
  0xc8   :  { %2116 = vset.pattern.permute.xlu1 %v2270_v19  ;;  %v1957_v30 = vpack.c.bf16 %v1202_v38, %v1201_v24  ;;  %v1204_v24 = vld [vmem:[%s3502_s3 + $0x118] sm:$0xff]  ;;  %v2011_v38 = vpack.c.bf16 %v1198_v31, %v1197_v28 }
  0xc9   :  { %v2177_v60 = vpack.i.bf16 %v942_v57, %v293_v8  ;;  %v2005_v57 = vpack.c.bf16 %v1178_v21, %v1177_v26  ;;  %v1196_v8 = vld [vmem:[%s3502_s3 + $0xd8] sm:$0xff]  ;;  %v287_v47 = vmax.f32 %v271_v58, 0.0  ;;  %v2009_v26 = vpack.c.bf16 %v1180_v44, %v1179_v42  ;;  %v1221_v44 = vld [vmem:[%s3502_s3 + $0x1a0] sm:$0xff] }
  0xca   :  { %1958 = vmatpush3.bf16.msra.mxu0 %v1957_v30  ;;  %v272_v58 = vadd.f32 %v2517_v37, %v251_v22  ;;  %v1181_v22 = vld [vmem:[%s3502_s3 + $0x60] sm:$0xff]  ;;  %v516_v30 = vadd.f32 %v2571_v61, %v495_v51  ;;  %v1199_v51 = vld [vmem:[%s3502_s3 + $0xf0] sm:$0xff] }
  0xcb   :  { %65 = vperm.xlu1 %2116, %v2382_v11   ;;  %2178 = vrot.lane.b32.xlu0 %v2177_v60, %s2274_s18  ;;  %v2007_v60 = vpack.c.bf16 %v1196_v8, %v1195_v63  ;;  %v2118_v6 = vpack.i.bf16 %v936_v34, %v287_v47  ;;  %v1203_v8 = vld [vmem:[%s3502_s3 + $0x110] sm:$0xff]  ;;  %v1182_v34 = vld [vmem:[%s3502_s3 + $0x68] sm:$0xff] }
  0xcc   :  { %v2671_v62 = vpop.permute.xlu1 %863  ;;  %2006 = vmatpush3.bf16.msra.mxu1 %v2005_v57  ;;  %v1219_v57 = vld [vmem:[%s3502_s3 + $0x190] sm:$0xff]  ;;  %v2013_v42 = vpack.c.bf16 %v1182_v34, %v1181_v22  ;;  %v1222_v47 = vld [vmem:[%s3502_s3 + $0x1a8] sm:$0xff] }
  0xcd   :  { %2008 = vmatprep.subr.bf16.mxu1 %v2007_v60  ;;  %v1959_v63 = vpack.c.bf16 %v1220_v4, %v1219_v57  ;;  %v1961_v60 = vpack.c.bf16 %v1204_v24, %v1203_v8  ;;  %v900_v57 = vmul.f32 %v2526_v40, %v2577_v0  ;;  %v1963_v28 = vpack.c.bf16 %v1222_v47, %v1221_v44  ;;  %v1183_v8 = vld [vmem:[%s3502_s3 + $0x70] sm:$0xff]  ;;  %v1184_v24 = vld [vmem:[%s3502_s3 + $0x78] sm:$0xff] }
  0xce   :  { %v2017_v22 = vpack.c.bf16 %v1184_v24, %v1183_v8  ;;  %v1223_v34 = vld [vmem:[%s3502_s3 + $0x1b0] sm:$0xff]  ;;  %v1208_v47 = vld [vmem:[%s3502_s3 + $0x138] sm:$0xff] }
  0xcf   :  { %2117 = vset.pattern.permute.xlu1 %v2271_v20  ;;  %753 = vperm.xlu0 %2101, %v2362_v9  }
  0xd0   :  { %725 = vperm.xlu1 %2117, %v2382_v11   ;;  %2010 = vmatpush3.bf16.msra.mxu1 %v2009_v26  ;;  %v288_v26 = vmax.f32 %v272_v58, 0.0  ;;  %v1206_v58 = vld [vmem:[%s3502_s3 + $0x128] sm:$0xff] }
  0xd1   :  { %v2704_v21 = vpop.permute.xlu1 %462  ;;  %1960 = vmatprep.subr.bf16.mxu0 %v1959_v63  ;;  %2012 = vmatprep.subr.bf16.mxu1 %v2011_v38  ;;  %v1205_v63 = vld [vmem:[%s3502_s3 + $0x120] sm:$0xff]  ;;  %v532_v38 = vmax.f32 %v516_v30, 0.0  ;;  %v921_v30 = vadd.f32 %v2532_v43, %v900_v57  ;;  %v1226_v57 = vld [vmem:[%s3502_s3 + $0x1c8] sm:$0xff] }
  0xd2   :  { %1962 = vmatpush3.bf16.msra.mxu0 %v1961_v60  ;;  %v1965_v0 = vpack.c.bf16 %v1206_v58, %v1205_v63  ;;  %v496_v60 = vmul.f32 %v2560_v56, %v2510_v33 }
  0xd3   :  { %2188 = vset.pattern.permute.xlu0 %v2272_v36  ;;  %1964 = vmatprep.subr.bf16.mxu0 %v1963_v28  ;;  %v2124_v44 = vpack.i.bf16 %v288_v26, %v532_v38  ;;  %v1225_v26 = vld [vmem:[%s3502_s3 + $0x1c0] sm:$0xff]  ;;  %v937_v63 = vmax.f32 %v921_v30, 0.0  ;;  %v1211_v30 = vld [vmem:[%s3502_s3 + $0x150] sm:$0xff] }
  0xd4   :  { %2119 = vrot.lane.b32.xlu1 %v2118_v6, %s2274_s18  ;;  %304 = vperm.xlu0 %2188, %v2323_v2   ;;  %v1200_v6 = vld [vmem:[%s3502_s3 + $0xf8] sm:$0xff]  ;;  %v1971_v58 = vpack.c.bf16 %v1226_v57, %v1225_v26  ;;  %v1213_v26 = vld [vmem:[%s3502_s3 + $0x160] sm:$0xff]  ;;  %v1214_v57 = vld [vmem:[%s3502_s3 + $0x168] sm:$0xff] }
  0xd5   :  { %2123 = vset.pattern.permute.xlu1 %v2272_v36  ;;  %2014 = vmatpush3.bf16.msra.mxu1 %v2013_v42  ;;  %v2015_v31 = vpack.c.bf16 %v1200_v6, %v1199_v51  ;;  %v1224_v42 = vld [vmem:[%s3502_s3 + $0x1b8] sm:$0xff]  ;;  %v517_v6 = vadd.f32 %v2571_v61, %v496_v60  ;;  %v1227_v60 = vld [vmem:[%s3502_s3 + $0x1d0] sm:$0xff] }
  0xd6   :  { %v2747_v4 = vpop.permute.xlu1 %867  ;;  %1966 = vmatpush3.bf16.msra.mxu0 %v1965_v0  ;;  %v1967_v33 = vpack.c.bf16 %v1224_v42, %v1223_v34  ;;  %v1210_v0 = vld [vmem:[%s3502_s3 + $0x148] sm:$0xff] }
  0xd7   :  { %2016 = vmatprep.subr.bf16.mxu1 %v2015_v31  ;;  %v1209_v31 = vld [vmem:[%s3502_s3 + $0x140] sm:$0xff]  ;;  %v533_v24 = vmax.f32 %v517_v6, 0.0 }
  0xd8   :  { %324 = vperm.xlu1 %2123, %v2330_v3   ;;  %316 = vperm.xlu0 %2188, %v2374_v10   ;;  %v1207_v10 = vld [vmem:[%s3502_s3 + $0x130] sm:$0xff]  ;;  %v1973_v8 = vpack.c.bf16 %v1210_v0, %v1209_v31  ;;  %v1232_v31 = vld [vmem:[%s3502_s3 + $0x1f8] sm:$0xff] }
  0xd9   :  { %2018 = vmatpush3.bf16.msra.mxu1 %v2017_v22  ;;  %v1969_v28 = vpack.c.bf16 %v1208_v47, %v1207_v10  ;;  %1968 = vmatprep.subr.bf16.mxu0 %v1967_v33  ;;  %v1228_v22 = vld [vmem:[%s3502_s3 + $0x1d8] sm:$0xff]  ;;  %v2130_v34 = vpack.i.bf16 %v533_v24, %v937_v63  ;;  %v1229_v47 = vld [vmem:[%s3502_s3 + $0x1e0] sm:$0xff]  ;;  %v1981_v63 = vpack.c.bf16 %v1214_v57, %v1213_v26  ;;  %v1215_v24 = vld [vmem:[%s3502_s3 + $0x170] sm:$0xff] }
  0xda   :  { %v1975_v42 = vpack.c.bf16 %v1228_v22, %v1227_v60  ;;  %v253_v22 = vmul.f32 %v2508_v32, %v2521_v39 }
  0xdb   :  { %v2781_v51 = vpop.permute.xlu1 %222  ;;  %1970 = vmatpush3.bf16.msra.mxu0 %v1969_v28  ;;  %v1230_v28 = vld [vmem:[%s3502_s3 + $0x1e8] sm:$0xff] }
  0xdc   :  { %2125 = vrot.lane.b32.xlu1 %v2124_v44, %s2274_s18  ;;  %320 = vperm.xlu0 %2188, %v2382_v11   ;;  %v1212_v44 = vld [vmem:[%s3502_s3 + $0x158] sm:$0xff]  ;;  %v1979_v6 = vpack.c.bf16 %v1230_v28, %v1229_v47  ;;  %v498_v47 = vmul.f32 %v2560_v56, %v2481_v23 }
  0xdd   :  { %2129 = vset.pattern.permute.xlu1 %v2271_v20  ;;  %1972 = vmatprep.subr.bf16.mxu0 %v1971_v58  ;;  %v1977_v33 = vpack.c.bf16 %v1212_v44, %v1211_v30  ;;  %v1231_v58 = vld [vmem:[%s3502_s3 + $0x1f0] sm:$0xff]  ;;  %v274_v30 = vadd.f32 %v2517_v37, %v253_v22 }
  0xde   :  { %v519_v57 = vadd.f32 %v2571_v61, %v498_v47 }
  0xdf   :  { %1974 = vmatpush3.bf16.msra.mxu0 %v1973_v8  ;;  %v1983_v8 = vpack.c.bf16 %v1232_v31, %v1231_v58  ;;  %v903_v31 = vmul.f32 %v2526_v40, %v2566_v59 }
  0xe0   :  { %v2799_v38 = vpop.permute.xlu1 %871  ;;  %729 = vperm.xlu1 %2129, %v2330_v3   ;;  %336 = vperm.xlu0 %2188, %v2390_v12   ;;  %v535_v23 = vmax.f32 %v519_v57, 0.0 }
  0xe1   :  { %1976 = vmatprep.subr.bf16.mxu0 %v1975_v42 }
  0xe3   :  { %1978 = vmatpush3.bf16.msra.mxu0 %v1977_v33 }
  0xe4   :  { %2131 = vrot.lane.b32.xlu1 %v2130_v34, %s2274_s18  ;;  %352 = vperm.xlu0 %2188, %v2439_v17   ;;  %v497_v34 = vmul.f32 %v2560_v56, %v2539_v48  ;;  %v290_v48 = vmax.f32 %v274_v30, 0.0  ;;  %v499_v30 = vmul.f32 %v2560_v56, %v2487_v25  ;;  %v904_v25 = vmul.f32 %v2526_v40, %v2599_v41 }
  0xe5   :  { %v2817_v10 = vpop.permute.xlu1 %226  ;;  %2135 = vset.pattern.permute.xlu1 %v2272_v36  ;;  %1980 = vmatprep.subr.bf16.mxu0 %v1979_v6 }
  0xe6   :  { %v518_v44 = vadd.f32 %v2571_v61, %v497_v34  ;;  %v255_v34 = vmul.f32 %v2508_v32, %v2579_v1  ;;  %v520_v1 = vadd.f32 %v2571_v61, %v499_v30  ;;  %v260_v41 = vmul.f32 %v2508_v32, %v2817_v10 }
  0xe7   :  { %1982 = vmatpush3.bf16.msra.mxu0 %v1981_v63 }
  0xe8   :  { %328 = vperm.xlu1 %2135, %v2343_v5   ;;  %2195 = vset.pattern.permute.xlu0 %v2273_v49  ;;  %v534_v33 = vmax.f32 %v518_v44, 0.0 }
  0xe9   :  { %953 = vperm.xlu0 %2195, %v2323_v2   ;;  %v1216_v2 = vld [vmem:[%s3502_s3 + $0x178] sm:$0xff]  ;;  %1984 = vmatprep.subr.bf16.mxu0 %v1983_v8 }
  0xea   :  { %v2841_v0 = vpop.permute.xlu1 %474  ;;  %v1985_v60 = vpack.c.bf16 %v1216_v2, %v1215_v24  ;;  %v2144_v28 = vpack.i.bf16 %v290_v48, %v534_v33  ;;  %v254_v24 = vmul.f32 %v2508_v32, %v2553_v54  ;;  %v924_v2 = vadd.f32 %v2532_v43, %v903_v31  ;;  %v876_v54 = vpop.permute.xlu0 %875 }
  0xeb   :  { %v276_v33 = vadd.f32 %v2517_v37, %v255_v34  ;;  %v909_v31 = vmul.f32 %v2526_v40, %v876_v54 }
  0xec   :  { %2136 = vset.pattern.permute.xlu1 %v2271_v20  ;;  %1986 = vmatpush3.bf16.msra.mxu0 %v1985_v60  ;;  %v275_v60 = vadd.f32 %v2517_v37, %v254_v24  ;;  %v940_v22 = vmax.f32 %v924_v2, 0.0  ;;  %v281_v2 = vadd.f32 %v2517_v37, %v260_v41 }
  0xed   :  { %733 = vperm.xlu1 %2136, %v2343_v5   ;;  %969 = vperm.xlu0 %2195, %v2382_v11   ;;  %v902_v11 = vmul.f32 %v2526_v40, %v2546_v52  ;;  %v930_v10 = vadd.f32 %v2532_v43, %v909_v31 }
  0xee   :  { %v291_v44 = vmax.f32 %v275_v60, 0.0  ;;  %v297_v34 = vmax.f32 %v281_v2, 0.0 }
  0xef   :  { %v2856_v42 = vpop.permute.xlu1 %230  ;;  %v923_v6 = vadd.f32 %v2532_v43, %v902_v11  ;;  %v292_v11 = vmax.f32 %v276_v33, 0.0 }
  0xf0   :  { %v2157_v48 = vpack.i.bf16 %v940_v22, %v291_v44  ;;  %v946_v44 = vmax.f32 %v930_v10, 0.0  ;;  %v906_v10 = vmul.f32 %v2526_v40, %v2671_v62 }
  0xf1   :  { %2137 = vset.pattern.permute.xlu1 %v2273_v49  ;;  %973 = vperm.xlu0 %2195, %v2330_v3   ;;  %v939_v52 = vmax.f32 %v923_v6, 0.0  ;;  %v925_v6 = vadd.f32 %v2532_v43, %v904_v25 }
  0xf2   :  { %977 = vperm.xlu1 %2137, %v2343_v5   ;;  %v927_v62 = vadd.f32 %v2532_v43, %v906_v10 }
  0xf3   :  { %v2150_v58 = vpack.i.bf16 %v535_v23, %v939_v52 }
  0xf4   :  { %v2863_v39 = vpop.permute.xlu1 %478 }
  0xf5   :  { %985 = vperm.xlu0 %2195, %v2390_v12  }
  0xf6   :  { %2143 = vset.pattern.permute.xlu1 %v2272_v36 }
  0xf7   :  { %332 = vperm.xlu1 %2143, %v2427_v16  }
  0xf9   :  { %v2873_v26 = vpop.permute.xlu1 %883  ;;  %989 = vperm.xlu0 %2195, %v2397_v13  }
  0xfb   :  { %2145 = vrot.lane.b32.xlu1 %v2144_v28, %s2274_s18  ;;  %v536_v28 = vmax.f32 %v520_v1, 0.0 }
  0xfc   :  { %2149 = vset.pattern.permute.xlu1 %v2273_v49 }
  0xfd   :  { %1001 = vperm.xlu0 %2195, %v2439_v17  }
  0xfe   :  { %v2880_v63 = vpop.permute.xlu1 %482 }
  0xff   :  { %981 = vperm.xlu1 %2149, %v2427_v16  }
 0x101   :  { %1005 = vperm.xlu0 %2195, %v2404_v14  }
 0x103   :  { %v2886_v8 = vpop.permute.xlu1 %887  ;;  %2151 = vrot.lane.b32.xlu1 %v2150_v58, %s2274_s18 }
 0x104   :  { %2155 = vset.pattern.permute.xlu1 %v2270_v19 }
 0x105   :  { %2210 = vset.pattern.permute.xlu0 %v2270_v19 }
 0x106   :  { %70 = vperm.xlu0 %2210, %v2330_v3  }
 0x107   :  { %85 = vperm.xlu1 %2155, %v2390_v12  }
 0x108   :  { %v2897_v59 = vpop.permute.xlu1 %45 }
 0x10a   :  { %75 = vperm.xlu0 %2210, %v2343_v5   ;;  %v2912_v5 = vpop.permute.xlu0 %879 }
 0x10b   :  { %2156 = vset.pattern.permute.xlu1 %v2271_v20 }
 0x10c   :  { %741 = vperm.xlu1 %2156, %v2390_v12   ;;  %v500_v12 = vmul.f32 %v2560_v56, %v2602_v45  ;;  %v941_v45 = vmax.f32 %v925_v6, 0.0 }
 0x10d   :  { %v2906_v3 = vpop.permute.xlu1 %709 }
 0x10e   :  { %80 = vperm.xlu0 %2210, %v2427_v16   ;;  %v2163_v16 = vpack.i.bf16 %v292_v11, %v536_v28  ;;  %v521_v57 = vadd.f32 %v2571_v61, %v500_v12  ;;  %v2924_v52 = vpop.permute.xlu0 %891  ;;  %v912_v12 = vmul.f32 %v2526_v40, %v2886_v8 }
 0x110   :  { %2158 = vrot.lane.b32.xlu1 %v2157_v48, %s2274_s18  ;;  %v537_v58 = vmax.f32 %v521_v57, 0.0  ;;  %v911_v48 = vmul.f32 %v2526_v40, %v2873_v26  ;;  %v257_v26 = vmul.f32 %v2508_v32, %v2537_v46  ;;  %v933_v8 = vadd.f32 %v2532_v43, %v912_v12 }
 0x111   :  { %2162 = vset.pattern.permute.xlu1 %v2272_v36 }
 0x112   :  { %v487_v47 = vpop.permute.xlu1 %486  ;;  %90 = vperm.xlu0 %2210, %v2397_v13   ;;  %v2934_v24 = vpop.permute.xlu0 %55  ;;  %v2169_v22 = vpack.i.bf16 %v537_v58, %v941_v45  ;;  %v932_v11 = vadd.f32 %v2532_v43, %v911_v48  ;;  %v278_v46 = vadd.f32 %v2517_v37, %v257_v26  ;;  %v502_v58 = vmul.f32 %v2560_v56, %v2704_v21 }
 0x113   :  { %v508_v25 = vmul.f32 %v2560_v56, %v487_v47 }
 0x114   :  { %340 = vperm.xlu1 %2162, %v2397_v13  }
 0x115   :  { %v529_v6 = vadd.f32 %v2571_v61, %v508_v25 }
 0x116   :  { %95 = vperm.xlu0 %2210, %v2350_v7   ;;  %v2943_v30 = vpop.permute.xlu0 %713 }
 0x117   :  { %v2926_v23 = vpop.permute.xlu1 %242  ;;  %v545_v2 = vmax.f32 %v529_v6, 0.0  ;;  %v907_v6 = vmul.f32 %v2526_v40, %v2747_v4 }
 0x118   :  { %2164 = vrot.lane.b32.xlu1 %v2163_v16, %s2274_s18  ;;  %v948_v16 = vmax.f32 %v932_v11, 0.0 }
 0x119   :  { %2168 = vset.pattern.permute.xlu1 %v2271_v20 }
 0x11a   :  { %100 = vperm.xlu0 %2210, %v2362_v9   ;;  %v2957_v1 = vpop.permute.xlu0 %721 }
 0x11c   :  { %v2937_v60 = vpop.permute.xlu1 %308  ;;  %745 = vperm.xlu1 %2168, %v2397_v13   ;;  %v2219_v13 = vpack.i.bf16 %v946_v44, %v297_v34  ;;  %v949_v34 = vmax.f32 %v933_v8, 0.0  ;;  %v258_v8 = vmul.f32 %v2508_v32, %v2542_v50 }
 0x11e   :  { %110 = vperm.xlu0 %2210, %v2404_v14   ;;  %v262_v14 = vmul.f32 %v2508_v32, %v2548_v53  ;;  %v2975_v47 = vpop.permute.xlu0 %2139  ;;  %v2247_v48 = vpack.i.bf16 %v545_v2, %v949_v34  ;;  %v279_v4 = vadd.f32 %v2517_v37, %v258_v8  ;;  %v259_v2 = vmul.f32 %v2508_v32, %v2781_v51 }
 0x11f   :  { %v908_v32 = vmul.f32 %v2526_v40, %v2799_v38  ;;  %v2258_v38 = vld [vmem:[%s3499_s0 + $0x68] sm:$0xff] }
 0x120   :  { %2170 = vrot.lane.b32.xlu1 %v2169_v22, %s2274_s18  ;;  %v283_v53 = vadd.f32 %v2517_v37, %v262_v14  ;;  %v295_v50 = vmax.f32 %v279_v4, 0.0  ;;  %v280_v10 = vadd.f32 %v2517_v37, %v259_v2  ;;  %v504_v37 = vmul.f32 %v2560_v56, %v2497_v29  ;;  %v3075_v29 = vld [vmem:[%s3501_s2] ss:$0 sm:$0xff] }
 0x121   :  { %v2945_v54 = vpop.permute.xlu1 %50  ;;  %2174 = vset.pattern.permute.xlu1 %v2272_v36 }
 0x122   :  { %115 = vperm.xlu0 %2210, %v2412_v15   ;;  %v501_v15 = vmul.f32 %v2560_v56, %v2649_v35  ;;  %v299_v57 = vmax.f32 %v283_v53, 0.0  ;;  %v943_v53 = vmax.f32 %v927_v62, 0.0  ;;  %v296_v51 = vmax.f32 %v280_v10, 0.0 }
 0x124   :  { %344 = vperm.xlu1 %2174, %v2350_v7   ;;  %v522_v35 = vadd.f32 %v2571_v61, %v501_v15  ;;  %v2237_v31 = vpack.i.bf16 %v948_v16, %v299_v57  ;;  %v3006_v15 = vld [vmem:[%s3501_s2 + $0x4] ss:$0 sm:$0xff] }
 0x126   :  { %v2952_v33 = vpop.permute.xlu1 %957  ;;  %2220 = vrot.lane.b32.xlu0 %v2219_v13, %s2274_s18  ;;  %v538_v45 = vmax.f32 %v522_v35, 0.0  ;;  %v523_v13 = vadd.f32 %v2571_v61, %v502_v58 }
 0x128   :  { %2175 = vset.pattern.permute.xlu1 %v2271_v20  ;;  %v539_v25 = vmax.f32 %v523_v13, 0.0 }
 0x129   :  { %749 = vperm.xlu1 %2175, %v2350_v7  }
 0x12a   :  { %120 = vperm.xlu0 %2210, %v2447_v18   ;;  %v2190_v35 = vpack.i.bf16 %v539_v25, %v943_v53  ;;  %v525_v53 = vadd.f32 %v2571_v61, %v504_v37 }
 0x12b   :  { %v2971_v28 = vpop.permute.xlu1 %312  ;;  %v738_v22 = vpop.permute.xlu0 %737 }
 0x12d   :  { %2176 = vset.pattern.permute.xlu1 %v2273_v49 }
 0x12e   :  { %993 = vperm.xlu1 %2176, %v2350_v7   ;;  %2230 = vset.pattern.permute.xlu0 %v2271_v20  ;;  %v294_v7 = vmax.f32 %v278_v46, 0.0 }
 0x12f   :  { %769 = vperm.xlu0 %2230, %v2447_v18   ;;  %v2993_v18 = vld [vmem:[%s3500_s1 + $0x4] ss:$0 sm:$0xff] }
 0x130   :  { %v2983_v41 = vpop.permute.xlu1 %717  ;;  %v783_v21 = vmul.f32 %v2993_v18, %v738_v22  ;;  %v2183_v44 = vpack.i.bf16 %v294_v7, %v538_v45  ;;  %v928_v45 = vadd.f32 %v2532_v43, %v907_v6 }
 0x132   :  { %2182 = vset.pattern.permute.xlu1 %v2272_v36  ;;  %v804_v11 = vadd.f32 %v3006_v15, %v783_v21 }
 0x133   :  { %348 = vperm.xlu1 %2182, %v2362_v9   ;;  %2238 = vrot.lane.b32.xlu0 %v2237_v31, %s2274_s18  ;;  %v944_v31 = vmax.f32 %v928_v45, 0.0 }
 0x134   :  { %2257 = vset.pattern.permute.xlu0 %v2270_v19  ;;  %v820_v12 = vmax.f32 %v804_v11, 0.0 }
 0x135   :  { %v3000_v14 = vpop.permute.xlu1 %961  ;;  %v2198_v7 = vpack.i.bf16 %v944_v31, %v295_v50  ;;  %v541_v31 = vmax.f32 %v525_v53, 0.0 }
 0x137   :  { %2184 = vrot.lane.b32.xlu1 %v2183_v44, %s2274_s18  ;;  %2248 = vrot.lane.b32.xlu0 %v2247_v48, %s2274_s18  ;;  %v3062_v44 = vld [vmem:[%s3500_s1 + $0x2] ss:$0 sm:$0xff]  ;;  %v929_v48 = vadd.f32 %v2532_v43, %v908_v32 }
 0x138   :  { %2189 = vset.pattern.permute.xlu1 %v2273_v49  ;;  %v372_v25 = vmul.f32 %v3062_v44, %v2937_v60  ;;  %v373_v45 = vmul.f32 %v3062_v44, %v2971_v28 }
 0x139   :  { %v945_v6 = vmax.f32 %v929_v48, 0.0 }
 0x13a   :  { %v3012_v26 = vpop.permute.xlu1 %60 }
 0x13b   :  { %997 = vperm.xlu1 %2189, %v2362_v9   ;;  %v2211_v32 = vpack.i.bf16 %v541_v31, %v945_v6 }
 0x13d   :  { %v3015_v16 = vpop.permute.xlu0 %2178 }
 0x13e   :  { %v2181_v46 = vunpack.i.h.bf16 %v3015_v16  ;;  %v3020_v57 = vpop.permute.xlu1 %2106 }
 0x13f   :  { %2191 = vrot.lane.b32.xlu1 %v2190_v35, %s2274_s18 }
 0x140   :  { %2196 = vset.pattern.permute.xlu1 %v2270_v19  ;;  %v3027_v9 = vsel %vm674_vm0, %v820_v12, %v2181_v46  ;;  %v503_v19 = vmul.f32 %v2560_v56, %v2492_v27  ;;  %v3053_v27 = vld [vmem:[%s3500_s1] ss:$0 sm:$0xff]  ;;  %v3083_v12 = vld [vmem:[%s3501_s2 + $0x2] ss:$0 sm:$0xff] }
 0x141   :  { %v127_v62 = vmul.f32 %v3053_v27, %v2897_v59  ;;  %v128_v60 = vmul.f32 %v3053_v27, %v2945_v54  ;;  %v393_v8 = vadd.f32 %v3083_v12, %v372_v25  ;;  %v129_v2 = vmul.f32 %v3053_v27, %v2934_v24 }
 0x142   :  { %v3030_v58 = vpop.permute.xlu1 %965  ;;  %v524_v21 = vadd.f32 %v2571_v61, %v503_v19  ;;  %v2109_v19 = vunpack.i.h.bf16 %v3020_v57  ;;  %v2108_v54 = vunpack.i.l.bf16 %v3020_v57  ;;  %v130_v57 = vmul.f32 %v3053_v27, %v3012_v26 }
 0x143   :  { %105 = vperm.xlu1 %2196, %v2439_v17   ;;  %v148_v46 = vadd.f32 %v3075_v29, %v127_v62  ;;  %v149_v28 = vadd.f32 %v3075_v29, %v128_v60  ;;  %v409_v37 = vmax.f32 %v393_v8, 0.0  ;;  %v150_v62 = vadd.f32 %v3075_v29, %v129_v2 }
 0x144   :  { %v540_v40 = vmax.f32 %v524_v21, 0.0  ;;  %v151_v8 = vadd.f32 %v3075_v29, %v130_v57  ;;  %v505_v57 = vmul.f32 %v2560_v56, %v2841_v0  ;;  %v3169_v0 = vld [vmem:[%s3501_s2 + $0x1] ss:$0 sm:$0xff] }
 0x145   :  { %v165_v6 = vmax.f32 %v149_v28, 0.0  ;;  %v166_v60 = vmax.f32 %v150_v62, 0.0  ;;  %v2141_v62 = vunpack.i.l.bf16 %v2975_v47 }
 0x146   :  { %v3036_v22 = vpop.permute.xlu1 %2112  ;;  %v2204_v11 = vpack.i.bf16 %v296_v51, %v540_v40  ;;  %v164_v51 = vmax.f32 %v148_v46, 0.0  ;;  %v394_v40 = vadd.f32 %v3083_v12, %v373_v45 }
 0x147   :  { %2197 = vset.pattern.permute.xlu1 %v2271_v20  ;;  %v2115_v10 = vunpack.i.h.bf16 %v3036_v22 }
 0x148   :  { %757 = vperm.xlu1 %2197, %v2439_v17   ;;  %v410_v46 = vmax.f32 %v394_v40, 0.0  ;;  %v3144_v40 = vld [vmem:[%s3500_s1 + $0x1] ss:$0 sm:$0xff] }
 0x14a   :  { %v3043_v34 = vpop.permute.xlu1 %65 }
 0x14c   :  { %2199 = vrot.lane.b32.xlu1 %v2198_v7, %s2274_s18 }
 0x14d   :  { %2203 = vset.pattern.permute.xlu1 %v2272_v36 }
 0x14e   :  { %v3055_v17 = vpop.permute.xlu0 %753 }
 0x14f   :  { %v3064_v13 = vpop.permute.xlu1 %725 }
 0x150   :  { %356 = vperm.xlu1 %2203, %v2258_v38  }
 0x153   :  { %v3085_v43 = vpop.permute.xlu1 %2119  ;;  %v305_v35 = vpop.permute.xlu0 %304 }
 0x154   :  { %v371_v59 = vmul.f32 %v3062_v44, %v305_v35  ;;  %2205 = vrot.lane.b32.xlu1 %v2204_v11, %s2274_s18  ;;  %v2121_v11 = vunpack.i.l.bf16 %v3085_v43 }
 0x155   :  { %2209 = vset.pattern.permute.xlu1 %v2271_v20 }
 0x156   :  { %v392_v4 = vadd.f32 %v3083_v12, %v371_v59  ;;  %v692_v59 = vsel %vm674_vm0, %v409_v37, %v2115_v10  ;;  %v676_v31 = vsel %vm674_vm0, %v165_v6, %v2121_v11  ;;  %v3132_v10 = vld [vmem:[%s3500_s1 + $0x6] ss:$0 sm:$0xff]  ;;  %v526_v6 = vadd.f32 %v2571_v61, %v505_v57 }
 0x157   :  { %v3100_v50 = vpop.permute.xlu1 %324  ;;  %v317_v7 = vpop.permute.xlu0 %316  ;;  %v1021_v11 = vmul.f32 %v3132_v10, %v2952_v33  ;;  %v506_v61 = vmul.f32 %v2560_v56, %v2863_v39  ;;  %v1023_v56 = vmul.f32 %v3132_v10, %v3030_v58  ;;  %v2122_v39 = vunpack.i.h.bf16 %v3085_v43  ;;  %v2265_v58 = vld [vmem:[%s3501_s2 + $0x3] ss:$0 sm:$0xff] }
 0x158   :  { %v408_v21 = vmax.f32 %v392_v4, 0.0  ;;  %761 = vperm.xlu1 %2209, %v2258_v38   ;;  %v374_v24 = vmul.f32 %v3062_v44, %v317_v7  ;;  %v675_v38 = vsel %vm674_vm0, %v164_v51, %v2109_v19  ;;  %v2259_v19 = vld [vmem:[%s3499_s0 + $0x70] sm:$0xff] }
 0x159   :  { %v527_v43 = vadd.f32 %v2265_v58, %v506_v61 }
 0x15a   :  { %v691_v48 = vsel %vm674_vm0, %v408_v21, %v2108_v54  ;;  %v395_v26 = vadd.f32 %v3083_v12, %v374_v24  ;;  %v167_v21 = vmax.f32 %v151_v8, 0.0  ;;  %v261_v24 = vmul.f32 %v3144_v40, %v2856_v42  ;;  %v3161_v42 = vld [vmem:[%s3501_s2 + $0x6] ss:$0 sm:$0xff] }
 0x15b   :  { %v2126_v25 = vpop.permute.xlu1 %2125  ;;  %1442 = vmatprep.mubr.f32.mxu1 %v691_v48  ;;  %v3113_v53 = vpop.permute.xlu0 %320  ;;  %v776_v48 = vmul.f32 %v2993_v18, %v2906_v3  ;;  %v2114_v8 = vunpack.i.l.bf16 %v3036_v22 }
 0x15c   :  { %v2127_v35 = vunpack.i.l.bf16 %v2126_v25  ;;  %2212 = vrot.lane.b32.xlu1 %v2211_v32, %s2274_s18  ;;  %1443 = vmatmul.mubr.f32.vlgmr.msra.gmra.mrb[0].mxu1 %v675_v38  ;;  %v2128_v45 = vunpack.i.h.bf16 %v2126_v25  ;;  %v411_v54 = vmax.f32 %v395_v26, 0.0  ;;  %v678_v38 = vsel %vm674_vm0, %v167_v21, %v2141_v62 }
 0x15d   :  { %1447 = vmatprep.mubr.f32.mxu1 %v692_v59  ;;  %2216 = vset.pattern.permute.xlu1 %v2272_v36  ;;  %v797_v33 = vadd.f32 %v3006_v15, %v776_v48  ;;  %v1042_v26 = vadd.f32 %v3161_v42, %v1021_v11  ;;  %v779_v48 = vmul.f32 %v2993_v18, %v2957_v1  ;;  %v2266_v11 = vld [vmem:[%s3500_s1 + $0x3] ss:$0 sm:$0xff] }
 0x15e   :  { %v693_v7 = vsel %vm674_vm0, %v410_v46, %v2127_v35  ;;  %v677_v51 = vsel %vm674_vm0, %v166_v60, %v2128_v45  ;;  %v1022_v60 = vmul.f32 %v3132_v10, %v3000_v14  ;;  %v778_v14 = vmul.f32 %v2993_v18, %v2983_v41  ;;  %v2263_v41 = vld [vmem:[%s3499_s0 + $0x78] sm:$0xff] }
 0x15f   :  { %v3120_v4 = vpop.permute.xlu1 %729  ;;  %v3123_v2 = vpop.permute.xlu0 %336  ;;  %v1058_v62 = vmax.f32 %v1042_v26, 0.0  ;;  %v263_v1 = vmul.f32 %v3144_v40, %v2555_v55  ;;  %v1044_v26 = vadd.f32 %v3161_v42, %v1023_v56 }
 0x160   :  { %360 = vperm.xlu1 %2216, %v2259_v19   ;;  %1448 = vmatmul.mubr.f32.gmra.mrb[2].mxu1 %v676_v31  ;;  %v2262_v31 = vld [vmem:[%s3500_s1 + $0x5] ss:$0 sm:$0xff]  ;;  %v799_v55 = vadd.f32 %v3006_v15, %v778_v14 }
 0x161   :  { %1452 = vmatprep.mubr.f32.mxu1 %v693_v7  ;;  %v910_v7 = vmul.f32 %v2262_v31, %v2912_v5  ;;  %v1043_v5 = vadd.f32 %v3161_v42, %v1022_v60  ;;  %v913_v14 = vmul.f32 %v2262_v31, %v2924_v52 }
 0x163   :  { %v3134_v32 = vpop.permute.xlu1 %2131  ;;  %v3137_v28 = vpop.permute.xlu0 %352 }
 0x164   :  { %v2134_v37 = vunpack.i.h.bf16 %v3134_v32  ;;  %2217 = vset.pattern.permute.xlu1 %v2271_v20  ;;  %1453 = vmatmul.mubr.f32.gmra.mrb[4].mxu1 %v677_v51  ;;  %v777_v20 = vmul.f32 %v2993_v18, %v2943_v30  ;;  %v282_v30 = vadd.f32 %v3169_v0, %v261_v24  ;;  %v813_v51 = vmax.f32 %v797_v33, 0.0 }
 0x165   :  { %765 = vperm.xlu1 %2217, %v2259_v19   ;;  %v2133_v60 = vunpack.i.l.bf16 %v3134_v32 }
 0x166   :  { %v694_v25 = vsel %vm674_vm0, %v411_v54, %v2134_v37  ;;  %v798_v46 = vadd.f32 %v3006_v15, %v777_v20  ;;  %v542_v37 = vmax.f32 %v526_v6, 0.0  ;;  %v1137_v57 = vsel %vm674_vm0, %v813_v51, %v2114_v8 }
 0x167   :  { %v3163_v3 = vpop.permute.xlu1 %328  ;;  %1457 = vmatprep.mubr.f32.mxu1 %v694_v25  ;;  %v507_v25 = vmul.f32 %v2266_v11, %v2880_v63  ;;  %v800_v6 = vadd.f32 %v3006_v15, %v779_v48  ;;  %v1059_v63 = vmax.f32 %v1043_v5, 0.0  ;;  %v284_v8 = vadd.f32 %v3169_v0, %v263_v1 }
 0x168   :  { %v954_v35 = vpop.permute.xlu0 %953  ;;  %1458 = vmatmul.mubr.f32.gmra.mrb[6].mxu1 %v678_v38  ;;  %v814_v24 = vmax.f32 %v798_v46, 0.0  ;;  %v131_v46 = vmul.f32 %v3053_v27, %v3043_v34  ;;  %v264_v34 = vmul.f32 %v3144_v40, %v2926_v23  ;;  %v780_v1 = vmul.f32 %v2993_v18, %v3064_v13 }
 0x169   :  { %v1020_v59 = vmul.f32 %v3132_v10, %v954_v35  ;;  %2218 = vset.pattern.permute.xlu1 %v2273_v49  ;;  %v528_v61 = vadd.f32 %v2265_v58, %v507_v25  ;;  %v300_v40 = vmax.f32 %v284_v8, 0.0  ;;  %v376_v58 = vmul.f32 %v3062_v44, %v3100_v50 }
 0x16a   :  { %1009 = vperm.xlu1 %2218, %v2259_v19   ;;  %v298_v19 = vmax.f32 %v282_v30, 0.0  ;;  %v375_v30 = vmul.f32 %v3062_v44, %v3113_v53  ;;  %v1138_v53 = vsel %vm674_vm0, %v814_v24, %v2122_v39  ;;  %v152_v24 = vadd.f32 %v3075_v29, %v131_v46 }
 0x16b   :  { %v1041_v45 = vadd.f32 %v3161_v42, %v1020_v59  ;;  %v544_v56 = vmax.f32 %v528_v61, 0.0  ;;  %v285_v39 = vadd.f32 %v3169_v0, %v264_v34 }
 0x16c   :  { %v3188_v54 = vpop.permute.xlu1 %733  ;;  %v970_v21 = vpop.permute.xlu0 %969  ;;  %v2225_v35 = vpack.i.bf16 %v298_v19, %v542_v37  ;;  %v815_v19 = vmax.f32 %v799_v55, 0.0  ;;  %v396_v32 = vadd.f32 %v3083_v12, %v375_v30  ;;  %v2142_v37 = vunpack.i.h.bf16 %v2975_v47 }
 0x16d   :  { %v1057_v22 = vmax.f32 %v1041_v45, 0.0  ;;  %v1024_v33 = vmul.f32 %v3132_v10, %v970_v21  ;;  %v801_v30 = vadd.f32 %v3006_v15, %v780_v1 }
 0x16e   :  { %2224 = vset.pattern.permute.xlu1 %v2272_v36  ;;  %v2264_v36 = vld [vmem:[%s3501_s2 + $0x5] ss:$0 sm:$0xff]  ;;  %v1139_v23 = vsel %vm674_vm0, %v815_v19, %v2133_v60  ;;  %v412_v52 = vmax.f32 %v396_v32, 0.0 }
 0x16f   :  { %364 = vperm.xlu1 %2224, %v2263_v41   ;;  %1709 = vmatprep.mubr.msk.f32.mxu0 %vm674_vm0, %v1057_v22  ;;  %v931_v20 = vadd.f32 %v2264_v36, %v910_v7  ;;  %v543_v7 = vmax.f32 %v527_v43, 0.0  ;;  %v1045_v51 = vadd.f32 %v3161_v42, %v1024_v33  ;;  %v816_v22 = vmax.f32 %v800_v6, 0.0 }
 0x170   :  { %1298 = vmatmul.mubr.f32.vlgmr.msra.gmra.mrb[0].mxu0 %v1137_v57  ;;  %v974_v38 = vpop.permute.xlu0 %973  ;;  %v934_v47 = vadd.f32 %v2264_v36, %v913_v14  ;;  %v168_v57 = vmax.f32 %v152_v24, 0.0  ;;  %v2242_v36 = vpack.i.bf16 %v300_v40, %v544_v56  ;;  %v397_v33 = vadd.f32 %v3083_v12, %v376_v58 }
 0x171   :  { %v3220_v59 = vpop.permute.xlu1 %977  ;;  %1710 = vmatprep.mubr.msk.f32.mxu0 %vm674_vm0, %v1058_v62  ;;  %v947_v45 = vmax.f32 %v931_v20, 0.0  ;;  %v1061_v31 = vmax.f32 %v1045_v51, 0.0  ;;  %v1140_v20 = vsel %vm674_vm0, %v816_v22, %v2142_v37  ;;  %v1025_v43 = vmul.f32 %v3132_v10, %v974_v38 }
 0x172   :  { %v950_v38 = vmax.f32 %v934_v47, 0.0  ;;  %v781_v14 = vmul.f32 %v2993_v18, %v3120_v4  ;;  %v1026_v22 = vmul.f32 %v3132_v10, %v3220_v59  ;;  %v377_v4 = vmul.f32 %v3062_v44, %v3163_v3 }
 0x173   :  { %2226 = vrot.lane.b32.xlu1 %v2225_v35, %s2274_s18  ;;  %v2232_v62 = vpack.i.bf16 %v543_v7, %v947_v45  ;;  %v301_v35 = vmax.f32 %v285_v39, 0.0  ;;  %v1046_v6 = vadd.f32 %v3161_v42, %v1025_v43  ;;  %v782_v3 = vmul.f32 %v2993_v18, %v3188_v54 }
 0x174   :  { %1303 = vmatmul.mubr.f32.gmra.mrb[2].mxu0 %v1138_v53  ;;  %v3231_v21 = vpop.permute.xlu0 %985  ;;  %2231 = vset.pattern.permute.xlu1 %v2273_v49  ;;  %v1060_v49 = vmax.f32 %v1044_v26, 0.0  ;;  %v817_v26 = vmax.f32 %v801_v30, 0.0  ;;  %v413_v53 = vmax.f32 %v397_v33, 0.0  ;;  %v1047_v40 = vadd.f32 %v3161_v42, %v1026_v22 }
 0x175   :  { %1711 = vmatprep.mubr.msk.f32.mxu0 %vm674_vm0, %v1059_v63  ;;  %v2252_v63 = vpack.i.bf16 %v950_v38, %v301_v35  ;;  %v1062_v8 = vmax.f32 %v1046_v6, 0.0  ;;  %v398_v58 = vadd.f32 %v3083_v12, %v377_v4 }
 0x176   :  { %v3242_v48 = vpop.permute.xlu1 %332  ;;  %v1063_v59 = vmax.f32 %v1047_v40, 0.0 }
 0x177   :  { %1013 = vperm.xlu1 %2231, %v2263_v41   ;;  %v414_v35 = vmax.f32 %v398_v58, 0.0 }
 0x178   :  { %1308 = vmatmul.mubr.f32.gmra.mrb[4].mxu0 %v1139_v23  ;;  %v3245_v5 = vpop.permute.xlu0 %989 }
 0x179   :  { %1712 = vmatprep.mubr.msk.f32.mxu0 %vm674_vm0, %v1060_v49  ;;  %v802_v49 = vadd.f32 %v3006_v15, %v781_v14 }
 0x17a   :  { %v2146_v41 = vpop.permute.xlu1 %2145 }
 0x17b   :  { %v2148_v11 = vunpack.i.h.bf16 %v2146_v41  ;;  %v2147_v25 = vunpack.i.l.bf16 %v2146_v41  ;;  %2233 = vrot.lane.b32.xlu1 %v2232_v62, %s2274_s18 }
 0x17c   :  { %1313 = vmatmul.mubr.f32.gmra.mrb[6].mxu0 %v1140_v20  ;;  %v3256_v0 = vpop.permute.xlu0 %1001 }
 0x17d   :  { %v695_v55 = vsel %vm674_vm0, %v412_v52, %v2147_v25  ;;  %v679_v13 = vsel %vm674_vm0, %v168_v57, %v2148_v11  ;;  %1713 = vmatprep.mubr.msk.f32.mxu0 %vm674_vm0, %v1061_v31  ;;  %v818_v52 = vmax.f32 %v802_v49, 0.0 }
 0x17e   :  { %v982_v50 = vpop.permute.xlu1 %981  ;;  %1462 = vmatprep.mubr.f32.mxu1 %v695_v55  ;;  %v378_v55 = vmul.f32 %v3062_v44, %v3242_v48 }
 0x17f   :  { %2243 = vrot.lane.b32.xlu1 %v2242_v36, %s2274_s18  ;;  %1463 = vmatmul.mubr.f32.gmra.mrb[8].mxu1 %v679_v13  ;;  %v1027_v38 = vmul.f32 %v3132_v10, %v982_v50 }
 0x180   :  { %v3265_v46 = vpop.permute.xlu0 %1005  ;;  %v399_v48 = vadd.f32 %v3083_v12, %v378_v55 }
 0x182   :  { %v2152_v60 = vpop.permute.xlu1 %2151 }
 0x183   :  { %v2154_v45 = vunpack.i.h.bf16 %v2152_v60  ;;  %v2153_v7 = vunpack.i.l.bf16 %v2152_v60  ;;  %2253 = vrot.lane.b32.xlu1 %v2252_v63, %s2274_s18  ;;  %v803_v63 = vadd.f32 %v3006_v15, %v782_v3  ;;  %v1028_v60 = vmul.f32 %v3132_v10, %v3231_v21 }
 0x185   :  { %v71_v61 = vpop.permute.xlu0 %70  ;;  %v1141_v34 = vsel %vm674_vm0, %v817_v26, %v2153_v7  ;;  %v696_v19 = vsel %vm674_vm0, %v413_v53, %v2154_v45  ;;  %v1048_v53 = vadd.f32 %v3161_v42, %v1027_v38  ;;  %v819_v50 = vmax.f32 %v803_v63, 0.0 }
 0x186   :  { %v132_v32 = vmul.f32 %v3053_v27, %v71_v61  ;;  %v3271_v51 = vpop.permute.xlu1 %85  ;;  %1318 = vmatmul.mubr.f32.gmra.mrb[8].mxu0 %v1141_v34  ;;  %1467 = vmatprep.mubr.f32.mxu1 %v696_v19  ;;  %v1049_v7 = vadd.f32 %v3161_v42, %v1028_v60  ;;  %v415_v61 = vmax.f32 %v399_v48, 0.0 }
 0x187   :  { %1714 = vmatprep.mubr.msk.f32.mxu0 %vm674_vm0, %v1062_v8  ;;  %v1064_v14 = vmax.f32 %v1048_v53, 0.0 }
 0x188   :  { %v153_v37 = vadd.f32 %v3075_v29, %v132_v32  ;;  %v2180_v32 = vunpack.i.l.bf16 %v3015_v16 }
 0x189   :  { %v76_v23 = vpop.permute.xlu0 %75 }
 0x18a   :  { %v169_v62 = vmax.f32 %v153_v37, 0.0  ;;  %v133_v56 = vmul.f32 %v3053_v27, %v76_v23  ;;  %v1065_v23 = vmax.f32 %v1049_v7, 0.0 }
 0x18b   :  { %v3279_v24 = vpop.permute.xlu1 %741 }
 0x18c   :  { %v154_v57 = vadd.f32 %v3075_v29, %v133_v56  ;;  %v135_v56 = vmul.f32 %v3053_v27, %v3271_v51 }
 0x18d   :  { %v81_v43 = vpop.permute.xlu0 %80 }
 0x18e   :  { %v170_v11 = vmax.f32 %v154_v57, 0.0  ;;  %v134_v25 = vmul.f32 %v3053_v27, %v81_v43 }
 0x18f   :  { %v2159_v39 = vpop.permute.xlu1 %2158 }
 0x190   :  { %v2161_v31 = vunpack.i.h.bf16 %v2159_v39  ;;  %v2160_v47 = vunpack.i.l.bf16 %v2159_v39  ;;  %v155_v26 = vadd.f32 %v3075_v29, %v134_v25 }
 0x191   :  { %v91_v43 = vpop.permute.xlu0 %90 }
 0x192   :  { %v1142_v1 = vsel %vm674_vm0, %v818_v52, %v2161_v31  ;;  %v680_v41 = vsel %vm674_vm0, %v169_v62, %v2160_v47  ;;  %v171_v8 = vmax.f32 %v155_v26, 0.0  ;;  %v379_v62 = vmul.f32 %v3062_v44, %v3123_v2 }
 0x193   :  { %v341_v20 = vpop.permute.xlu1 %340  ;;  %1323 = vmatmul.mubr.f32.gmra.mrb[10].mxu0 %v1142_v1  ;;  %1468 = vmatmul.mubr.f32.gmra.mrb[10].mxu1 %v680_v41  ;;  %v156_v52 = vadd.f32 %v3075_v29, %v135_v56  ;;  %v1029_v2 = vmul.f32 %v3132_v10, %v3245_v5 }
 0x194   :  { %1715 = vmatprep.mubr.msk.f32.mxu0 %vm674_vm0, %v1063_v59  ;;  %v682_v49 = vsel %vm674_vm0, %v171_v8, %v2180_v32  ;;  %v400_v39 = vadd.f32 %v3083_v12, %v379_v62  ;;  %v784_v59 = vmul.f32 %v2993_v18, %v3279_v24  ;;  %v380_v57 = vmul.f32 %v3062_v44, %v341_v20 }
 0x195   :  { %v172_v47 = vmax.f32 %v156_v52, 0.0  ;;  %v1050_v24 = vadd.f32 %v3161_v42, %v1029_v2  ;;  %v96_v5 = vpop.permute.xlu0 %95 }
 0x196   :  { %v416_v31 = vmax.f32 %v400_v39, 0.0  ;;  %v805_v3 = vadd.f32 %v3006_v15, %v784_v59  ;;  %v401_v25 = vadd.f32 %v3083_v12, %v380_v57  ;;  %v137_v7 = vmul.f32 %v3053_v27, %v96_v5 }
 0x197   :  { %v2165_v36 = vpop.permute.xlu1 %2164 }
 0x198   :  { %v2167_v13 = vunpack.i.h.bf16 %v2165_v36  ;;  %v2166_v30 = vunpack.i.l.bf16 %v2165_v36  ;;  %v821_v36 = vmax.f32 %v805_v3, 0.0 }
 0x199   :  { %v101_v48 = vpop.permute.xlu0 %100 }
 0x19a   :  { %v697_v33 = vsel %vm674_vm0, %v414_v35, %v2166_v30  ;;  %v681_v6 = vsel %vm674_vm0, %v170_v11, %v2167_v13  ;;  %v417_v35 = vmax.f32 %v401_v25, 0.0  ;;  %v1066_v30 = vmax.f32 %v1050_v24, 0.0 }
 0x19b   :  { %v3301_v54 = vpop.permute.xlu1 %745  ;;  %1472 = vmatprep.mubr.f32.mxu1 %v697_v33  ;;  %v138_v52 = vmul.f32 %v3053_v27, %v101_v48 }
 0x19c   :  { %1473 = vmatmul.mubr.f32.gmra.mrb[12].mxu1 %v681_v6  ;;  %v136_v6 = vmul.f32 %v3053_v27, %v91_v43  ;;  %v785_v26 = vmul.f32 %v2993_v18, %v3301_v54  ;;  %v787_v43 = vmul.f32 %v2993_v18, %v3055_v17 }
 0x19d   :  { %v159_v3 = vadd.f32 %v3075_v29, %v138_v52 }
 0x19e   :  { %v157_v60 = vadd.f32 %v3075_v29, %v136_v6  ;;  %v806_v8 = vadd.f32 %v3006_v15, %v785_v26 }
 0x19f   :  { %v2171_v45 = vpop.permute.xlu1 %2170 }
 0x1a0   :  { %v2173_v34 = vunpack.i.h.bf16 %v2171_v45  ;;  %v2172_v19 = vunpack.i.l.bf16 %v2171_v45  ;;  %v173_v45 = vmax.f32 %v157_v60, 0.0  ;;  %v822_v32 = vmax.f32 %v806_v8, 0.0 }
 0x1a2   :  { %v1143_v22 = vsel %vm674_vm0, %v819_v50, %v2172_v19  ;;  %v698_v21 = vsel %vm674_vm0, %v415_v61, %v2173_v34 }
 0x1a3   :  { %v345_v37 = vpop.permute.xlu1 %344  ;;  %1328 = vmatmul.mubr.f32.gmra.mrb[12].mxu0 %v1143_v22  ;;  %1477 = vmatprep.mubr.f32.mxu1 %v698_v21  ;;  %v158_v21 = vadd.f32 %v3075_v29, %v137_v7 }
 0x1a4   :  { %1716 = vmatprep.mubr.msk.f32.mxu0 %vm674_vm0, %v1064_v14  ;;  %1478 = vmatmul.mubr.f32.gmra.mrb[14].mxu1 %v682_v49  ;;  %v381_v34 = vmul.f32 %v3062_v44, %v345_v37  ;;  %v3351_v14 = vpop.permute.xlu0 %110 }
 0x1a5   :  { %v174_v37 = vmax.f32 %v158_v21, 0.0 }
 0x1a6   :  { %v402_v62 = vadd.f32 %v3083_v12, %v381_v34 }
 0x1a7   :  { %1333 = vmatmul.mubr.f32.gmra.mrb[14].mxu0 %v3027_v9 }
 0x1a8   :  { %v3314_v40 = vpop.permute.xlu1 %749  ;;  %1717 = vmatprep.mubr.msk.f32.mxu0 %vm674_vm0, %v1065_v23  ;;  %v3360_v39 = vpop.permute.xlu0 %115 }
 0x1a9   :  { %v786_v59 = vmul.f32 %v2993_v18, %v3314_v40 }
 0x1ab   :  { %v807_v40 = vadd.f32 %v3006_v15, %v786_v59  ;;  %v1033_v59 = vmul.f32 %v3132_v10, %v3265_v46 }
 0x1ac   :  { %v2221_v24 = vpop.permute.xlu0 %2220 }
 0x1ad   :  { %v994_v16 = vpop.permute.xlu1 %993  ;;  %v2223_v6 = vunpack.i.h.bf16 %v2221_v24 }
 0x1ae   :  { %v1030_v53 = vmul.f32 %v3132_v10, %v994_v16 }
 0x1b0   :  { %v1051_v61 = vadd.f32 %v3161_v42, %v1030_v53 }
 0x1b2   :  { %v3323_v4 = vpop.permute.xlu1 %348  ;;  %v1067_v49 = vmax.f32 %v1051_v61, 0.0 }
 0x1b3   :  { %v382_v57 = vmul.f32 %v3062_v44, %v3323_v4 }
 0x1b5   :  { %v403_v4 = vadd.f32 %v3083_v12, %v382_v57  ;;  %v141_v57 = vmul.f32 %v3053_v27, %v3360_v39  ;;  %v1054_v39 = vadd.f32 %v3161_v42, %v1033_v59 }
 0x1b6   :  { %v2185_v9 = vpop.permute.xlu1 %2184 }
 0x1b7   :  { %v2187_v1 = vunpack.i.h.bf16 %v2185_v9  ;;  %v2186_v41 = vunpack.i.l.bf16 %v2185_v9  ;;  %v2275_v9 = vmov 0.0|0.0   ;;  %v419_v5 = vmax.f32 %v403_v4, 0.0 }
 0x1b8   :  { %2019 = vmatprep.subr.bf16.mxu0 %v2275_v9 }
 0x1b9   :  { %v699_v51 = vsel %vm674_vm0, %v416_v31, %v2186_v41  ;;  %v683_v58 = vsel %vm674_vm0, %v172_v47, %v2187_v1  ;;  %v418_v31 = vmax.f32 %v402_v62, 0.0 }
 0x1ba   :  { %v998_v11 = vpop.permute.xlu1 %997  ;;  %1482 = vmatprep.mubr.f32.mxu1 %v699_v51 }
 0x1bb   :  { %1483 = vmatmul.mubr.f32.gmra.mrb[16].mxu1 %v683_v58  ;;  %v1031_v2 = vmul.f32 %v3132_v10, %v998_v11  ;;  %v1032_v11 = vmul.f32 %v3132_v10, %v3256_v0 }
 0x1be   :  { %v2192_v20 = vpop.permute.xlu1 %2191 }
 0x1bf   :  { %v2194_v55 = vunpack.i.h.bf16 %v2192_v20  ;;  %v2193_v13 = vunpack.i.l.bf16 %v2192_v20  ;;  %v1052_v20 = vadd.f32 %v3161_v42, %v1031_v2 }
 0x1c1   :  { %v1145_v38 = vsel %vm674_vm0, %v821_v36, %v2193_v13  ;;  %v700_v33 = vsel %vm674_vm0, %v417_v35, %v2194_v55  ;;  %v808_v36 = vadd.f32 %v3006_v15, %v787_v43  ;;  %v175_v35 = vmax.f32 %v159_v3, 0.0 }
 0x1c2   :  { %v3338_v63 = vpop.permute.xlu1 %105  ;;  %1338 = vmatmul.mubr.f32.gmra.mrb[16].mxu0 %v1145_v38  ;;  %1487 = vmatprep.mubr.f32.mxu1 %v700_v33  ;;  %v2222_v55 = vunpack.i.l.bf16 %v2221_v24  ;;  %v823_v13 = vmax.f32 %v807_v40, 0.0  ;;  %v1053_v33 = vadd.f32 %v3161_v42, %v1032_v11  ;;  %v1068_v26 = vmax.f32 %v1052_v20, 0.0 }
 0x1c3   :  { %1718 = vmatprep.mubr.msk.f32.mxu0 %vm674_vm0, %v1066_v30  ;;  %v824_v8 = vmax.f32 %v808_v36, 0.0  ;;  %v162_v3 = vadd.f32 %v3075_v29, %v141_v57 }
 0x1c4   :  { %v686_v53 = vsel %vm674_vm0, %v175_v35, %v2222_v55 }
 0x1c5   :  { %v1148_v7 = vsel %vm674_vm0, %v824_v8, %v2223_v6 }
 0x1c7   :  { %v3345_v50 = vpop.permute.xlu1 %757 }
 0x1c8   :  { %v788_v62 = vmul.f32 %v2993_v18, %v3345_v50 }
 0x1cb   :  { %v2200_v19 = vpop.permute.xlu1 %2199 }
 0x1cc   :  { %v2202_v54 = vunpack.i.h.bf16 %v2200_v19  ;;  %v2201_v22 = vunpack.i.l.bf16 %v2200_v19  ;;  %v383_v19 = vmul.f32 %v3062_v44, %v3137_v28 }
 0x1ce   :  { %v1146_v23 = vsel %vm674_vm0, %v822_v32, %v2202_v54  ;;  %v684_v16 = vsel %vm674_vm0, %v173_v45, %v2201_v22  ;;  %v1069_v45 = vmax.f32 %v1053_v33, 0.0  ;;  %v121_v32 = vpop.permute.xlu0 %120  ;;  %v139_v54 = vmul.f32 %v3053_v27, %v3338_v63 }
 0x1cf   :  { %v3357_v56 = vpop.permute.xlu1 %356  ;;  %1343 = vmatmul.mubr.f32.gmra.mrb[18].mxu0 %v1146_v23  ;;  %1488 = vmatmul.mubr.f32.gmra.mrb[18].mxu1 %v684_v16  ;;  %v404_v21 = vadd.f32 %v3083_v12, %v383_v19  ;;  %v140_v23 = vmul.f32 %v3053_v27, %v3351_v14  ;;  %v142_v11 = vmul.f32 %v3053_v27, %v121_v32 }
 0x1d0   :  { %1719 = vmatprep.mubr.msk.f32.mxu0 %vm674_vm0, %v1067_v49  ;;  %v160_v49 = vadd.f32 %v3075_v29, %v139_v54 }
 0x1d1   :  { %v420_v52 = vmax.f32 %v404_v21, 0.0 }
 0x1d2   :  { %v770_v16 = vpop.permute.xlu0 %769 }
 0x1d3   :  { %v2206_v47 = vpop.permute.xlu1 %2205 }
 0x1d4   :  { %v2208_v1 = vunpack.i.h.bf16 %v2206_v47  ;;  %v2207_v41 = vunpack.i.l.bf16 %v2206_v47 }
 0x1d6   :  { %v701_v51 = vsel %vm674_vm0, %v418_v31, %v2207_v41  ;;  %v685_v58 = vsel %vm674_vm0, %v174_v37, %v2208_v1  ;;  %v384_v37 = vmul.f32 %v3062_v44, %v3357_v56  ;;  %v176_v31 = vmax.f32 %v160_v49, 0.0 }
 0x1d7   :  { %v762_v25 = vpop.permute.xlu1 %761  ;;  %1492 = vmatprep.mubr.f32.mxu1 %v701_v51  ;;  %v161_v1 = vadd.f32 %v3075_v29, %v140_v23  ;;  %v809_v56 = vadd.f32 %v3006_v15, %v788_v62 }
 0x1d8   :  { %1493 = vmatmul.mubr.f32.gmra.mrb[20].mxu1 %v685_v58  ;;  %v789_v14 = vmul.f32 %v2993_v18, %v762_v25  ;;  %v405_v2 = vadd.f32 %v3083_v12, %v384_v37  ;;  %v2239_v58 = vpop.permute.xlu0 %2238 }
 0x1d9   :  { %v177_v40 = vmax.f32 %v161_v1, 0.0  ;;  %v2240_v20 = vunpack.i.l.bf16 %v2239_v58  ;;  %v825_v36 = vmax.f32 %v809_v56, 0.0  ;;  %v2241_v8 = vunpack.i.h.bf16 %v2239_v58 }
 0x1da   :  { %v810_v25 = vadd.f32 %v3006_v15, %v789_v14  ;;  %v421_v35 = vmax.f32 %v405_v2, 0.0 }
 0x1db   :  { %v2213_v17 = vpop.permute.xlu1 %2212 }
 0x1dc   :  { %v2215_v30 = vunpack.i.h.bf16 %v2213_v17  ;;  %v2214_v38 = vunpack.i.l.bf16 %v2213_v17  ;;  %v826_v33 = vmax.f32 %v810_v25, 0.0 }
 0x1de   :  { %v1147_v60 = vsel %vm674_vm0, %v823_v13, %v2214_v38  ;;  %v702_v48 = vsel %vm674_vm0, %v419_v5, %v2215_v30  ;;  %v1070_v30 = vmax.f32 %v1054_v39, 0.0  ;;  %v178_v38 = vmax.f32 %v162_v3, 0.0 }
 0x1df   :  { %v361_v0 = vpop.permute.xlu1 %360  ;;  %1348 = vmatmul.mubr.f32.gmra.mrb[20].mxu0 %v1147_v60  ;;  %1497 = vmatprep.mubr.f32.mxu1 %v702_v48 }
 0x1e0   :  { %1720 = vmatprep.mubr.msk.f32.mxu0 %vm674_vm0, %v1068_v26  ;;  %1498 = vmatmul.mubr.f32.gmra.mrb[22].mxu1 %v686_v53  ;;  %v385_v46 = vmul.f32 %v3062_v44, %v361_v0  ;;  %v2249_v26 = vpop.permute.xlu0 %2248  ;;  %v163_v53 = vadd.f32 %v3075_v29, %v142_v11  ;;  %v3442_v11 = vld [vmem:[%s3503_s4] ss:$0 sm:$0xff] }
 0x1e1   :  { %v2250_v37 = vunpack.i.l.bf16 %v2249_v26 }
 0x1e2   :  { %v179_v23 = vmax.f32 %v163_v53, 0.0 }
 0x1e3   :  { %1353 = vmatmul.mubr.f32.gmra.mrb[22].mxu0 %v1148_v7  ;;  %v688_v7 = vsel %vm674_vm0, %v177_v40, %v2240_v20 }
 0x1e4   :  { %v766_v61 = vpop.permute.xlu1 %765  ;;  %1721 = vmatprep.mubr.msk.f32.mxu0 %vm674_vm0, %v1069_v45 }
 0x1e5   :  { %v790_v24 = vmul.f32 %v2993_v18, %v766_v61 }
 0x1e7   :  { %v811_v6 = vadd.f32 %v3006_v15, %v790_v24 }
 0x1e9   :  { %v1010_v34 = vpop.permute.xlu1 %1009  ;;  %v827_v54 = vmax.f32 %v811_v6, 0.0 }
 0x1ea   :  { %v1034_v4 = vmul.f32 %v3132_v10, %v1010_v34 }
 0x1ec   :  { %v1055_v60 = vadd.f32 %v3161_v42, %v1034_v4 }
 0x1ee   :  { %v365_v22 = vpop.permute.xlu1 %364  ;;  %v1071_v29 = vmax.f32 %v1055_v60, 0.0 }
 0x1ef   :  { %v386_v43 = vmul.f32 %v3062_v44, %v365_v22  ;;  %v406_v44 = vadd.f32 %v3083_v12, %v385_v46  ;;  %v1150_v22 = vsel %vm674_vm0, %v826_v33, %v2241_v8 }
 0x1f1   :  { %v407_v17 = vadd.f32 %v3083_v12, %v386_v43  ;;  %v791_v12 = vmul.f32 %v2993_v18, %v770_v16  ;;  %v422_v61 = vmax.f32 %v406_v44, 0.0 }
 0x1f2   :  { %v2227_v28 = vpop.permute.xlu1 %2226 }
 0x1f3   :  { %v2229_v47 = vunpack.i.h.bf16 %v2227_v28  ;;  %v2228_v63 = vunpack.i.l.bf16 %v2227_v28  ;;  %v423_v34 = vmax.f32 %v407_v17, 0.0  ;;  %v812_v62 = vadd.f32 %v3006_v15, %v791_v12 }
 0x1f5   :  { %v703_v50 = vsel %vm674_vm0, %v420_v52, %v2228_v63  ;;  %v687_v41 = vsel %vm674_vm0, %v176_v31, %v2229_v47  ;;  %v1151_v47 = vsel %vm674_vm0, %v827_v54, %v2250_v37  ;;  %v828_v59 = vmax.f32 %v812_v62, 0.0 }
 0x1f6   :  { %v1014_v51 = vpop.permute.xlu1 %1013  ;;  %1502 = vmatprep.mubr.f32.mxu1 %v703_v50 }
 0x1f7   :  { %1503 = vmatmul.mubr.f32.gmra.mrb[24].mxu1 %v687_v41  ;;  %v1035_v27 = vmul.f32 %v3132_v10, %v1014_v51  ;;  %v2251_v10 = vunpack.i.h.bf16 %v2249_v26 }
 0x1f9   :  { %v1056_v18 = vadd.f32 %v3161_v42, %v1035_v27  ;;  %v706_v52 = vsel %vm674_vm0, %v423_v34, %v2251_v10 }
 0x1fa   :  { %v2234_v55 = vpop.permute.xlu1 %2233 }
 0x1fb   :  { %v2236_v13 = vunpack.i.h.bf16 %v2234_v55  ;;  %v2235_v5 = vunpack.i.l.bf16 %v2234_v55  ;;  %v1072_v31 = vmax.f32 %v1056_v18, 0.0 }
 0x1fd   :  { %v1149_v48 = vsel %vm674_vm0, %v825_v36, %v2235_v5  ;;  %v704_v0 = vsel %vm674_vm0, %v421_v35, %v2236_v13 }
 0x1fe   :  { %v2244_v45 = vpop.permute.xlu1 %2243  ;;  %1358 = vmatmul.mubr.f32.gmra.mrb[24].mxu0 %v1149_v48  ;;  %1507 = vmatprep.mubr.f32.mxu1 %v704_v0 }
 0x1ff   :  { %v2246_v19 = vunpack.i.h.bf16 %v2244_v45  ;;  %v2245_v32 = vunpack.i.l.bf16 %v2244_v45  ;;  %1722 = vmatprep.mubr.msk.f32.mxu0 %vm674_vm0, %v1070_v30  ;;  %1508 = vmatmul.mubr.f32.gmra.mrb[26].mxu1 %v688_v7 }
 0x201   :  { %v705_v21 = vsel %vm674_vm0, %v422_v61, %v2245_v32  ;;  %v689_v49 = vsel %vm674_vm0, %v178_v38, %v2246_v19 }
 0x202   :  { %v2254_v16 = vpop.permute.xlu1 %2253  ;;  %1363 = vmatmul.mubr.f32.gmra.mrb[26].mxu0 %v1150_v22  ;;  %1512 = vmatprep.mubr.f32.mxu1 %v705_v21 }
 0x203   :  { %v2255_v28 = vunpack.i.l.bf16 %v2254_v16  ;;  %1723 = vmatprep.mubr.msk.f32.mxu0 %vm674_vm0, %v1071_v29  ;;  %1513 = vmatmul.mubr.f32.gmra.mrb[28].mxu1 %v689_v49  ;;  %v2256_v42 = vunpack.i.h.bf16 %v2254_v16 }
 0x204   :  { %1517 = vmatprep.mubr.f32.mxu1 %v706_v52 }
 0x205   :  { %v690_v63 = vsel %vm674_vm0, %v179_v23, %v2255_v28  ;;  %v1152_v15 = vsel %vm674_vm0, %v828_v59, %v2256_v42  ;;  %v2277_v28 = vmov 0.0  }
 0x206   :  { %1368 = vmatmul.mubr.f32.gmra.mrb[28].mxu0 %v1151_v47 }
 0x207   :  { %1724 = vmatprep.mubr.msk.f32.mxu0 %vm674_vm0, %v1072_v31  ;;  %1518 = vmatmul.mubr.f32.gmra.mrb[30].mxu1 %v690_v63 }
 0x20a   :  { %1373 = vmatmul.mubr.f32.gmra.mrb[30].mxu0 %v1152_v15 }
 0x20b   :  { %1952 = vmatprep.mubr.msk.f32.mxu0 %vm2276_vm2, %v2277_v28 }
 0x22f   :  { %v1855_v57 = vpop.f32.mrb[0].mxu1 }
 0x230   :  { %v1856_v14 = vpop.f32.mrb[1].mxu1 }
 0x231   :  { %v1857_v1 = vadd.f32 %v1856_v14, %v1855_v57  ;;  %v1563_v57 = vld [vmem:[%s3504_s6] sm:$0xff] }
 0x232   :  { %1566 = vperm.xlu0 %2257, %v1563_v57  }
 0x233   :  { %v1858_v50 = vpop.f32.mrb[2].mxu1 }
 0x234   :  { %v1859_v41 = vpop.f32.mrb[3].mxu1 }
 0x235   :  { %v1860_v56 = vadd.f32 %v1859_v41, %v1858_v50 }
 0x237   :  { %v1861_v2 = vpop.f32.mrb[4].mxu1 }
 0x238   :  { %v1862_v51 = vpop.f32.mrb[5].mxu1 }
 0x239   :  { %v1863_v58 = vadd.f32 %v1862_v51, %v1861_v2 }
 0x23b   :  { %v1864_v46 = vpop.f32.mrb[6].mxu1 }
 0x23c   :  { %v1865_v43 = vpop.f32.mrb[7].mxu1 }
 0x23d   :  { %v1866_v39 = vadd.f32 %v1865_v43, %v1864_v46 }
 0x243   :  { %v1775_v3 = vpop.f32.mrb[0].mxu0 }
 0x244   :  { %v1776_v25 = vpop.f32.mrb[1].mxu0 }
 0x245   :  { %v1777_v24 = vadd.f32 %v1776_v25, %v1775_v3 }
 0x247   :  { %v1445_v40 = vadd.f32 %v1857_v1, %v1777_v24  ;;  %v1778_v4 = vpop.f32.mrb[2].mxu0 }
 0x248   :  { %v1779_v20 = vpop.f32.mrb[3].mxu0 }
 0x249   :  { %v1780_v36 = vadd.f32 %v1779_v20, %v1778_v4  ;;  %v1530_v35 = vadd.f32 %v3442_v11, %v1445_v40 }
 0x24b   :  { %v1450_v55 = vadd.f32 %v1860_v56, %v1780_v36  ;;  %v1781_v44 = vpop.f32.mrb[4].mxu0  ;;  %v1546_v30 = vmax.f32 %v1530_v35, 0.0 }
 0x24c   :  { %v1782_v17 = vpop.f32.mrb[5].mxu0 }
 0x24d   :  { %v1531_v13 = vadd.f32 %v3442_v11, %v1450_v55  ;;  %v1783_v5 = vadd.f32 %v1782_v17, %v1781_v44 }
 0x24f   :  { %v1547_v38 = vmax.f32 %v1531_v13, 0.0  ;;  %v1455_v33 = vadd.f32 %v1863_v58, %v1783_v5  ;;  %v1784_v6 = vpop.f32.mrb[6].mxu0 }
 0x250   :  { %v1785_v26 = vpop.f32.mrb[7].mxu0 }
 0x251   :  { %v2020_v27 = vpack.c.bf16 %v1547_v38, %v1546_v30  ;;  %v1786_v48 = vadd.f32 %v1785_v26, %v1784_v6  ;;  %v1532_v53 = vadd.f32 %v3442_v11, %v1455_v33 }
 0x252   :  { %v1867_v0 = vpop.f32.mrb[8].mxu1 }
 0x253   :  { %v1460_v12 = vadd.f32 %v1866_v39, %v1786_v48  ;;  %v1868_v8 = vpop.f32.mrb[9].mxu1  ;;  %2022 = vmatpush3.bf16.xpose.msk.msra.mxu0 %vm3448_vm1, %v2020_v27  ;;  %v1548_v61 = vmax.f32 %v1532_v53, 0.0 }
 0x254   :  { %v1869_v45 = vadd.f32 %v1868_v8, %v1867_v0  ;;  %2023 = vmatprep.subr.bf16.mxu0 %v2275_v9 }
 0x255   :  { %v1533_v7 = vadd.f32 %v3442_v11, %v1460_v12 }
 0x257   :  { %v1549_v34 = vmax.f32 %v1533_v7, 0.0 }
 0x259   :  { %v2024_v19 = vpack.c.bf16 %v1549_v34, %v1548_v61  ;;  %v1787_v32 = vpop.f32.mrb[8].mxu0 }
 0x25a   :  { %v1788_v10 = vpop.f32.mrb[9].mxu0 }
 0x25b   :  { %v1789_v54 = vadd.f32 %v1788_v10, %v1787_v32  ;;  %2026 = vmatpush3.bf16.xpose.msk.msra.mxu0 %vm3448_vm1, %v2024_v19 }
 0x25c   :  { %2027 = vmatprep.subr.bf16.mxu0 %v2275_v9 }
 0x25d   :  { %v1465_v22 = vadd.f32 %v1869_v45, %v1789_v54 }
 0x25f   :  { %v1534_v62 = vadd.f32 %v3442_v11, %v1465_v22 }
 0x261   :  { %v1550_v31 = vmax.f32 %v1534_v62, 0.0 }
 0x266   :  { %v1790_v29 = vpop.f32.mrb[10].mxu0  ;;  %v1870_v18 = vpop.f32.mrb[10].mxu1 }
 0x267   :  { %v1791_v21 = vpop.f32.mrb[11].mxu0  ;;  %v1871_v49 = vpop.f32.mrb[11].mxu1 }
 0x268   :  { %v1792_v23 = vadd.f32 %v1791_v21, %v1790_v29  ;;  %v1872_v16 = vadd.f32 %v1871_v49, %v1870_v18 }
 0x26a   :  { %v1470_v37 = vadd.f32 %v1872_v16, %v1792_v23 }
 0x26c   :  { %v1535_v52 = vadd.f32 %v3442_v11, %v1470_v37 }
 0x26e   :  { %v1551_v42 = vmax.f32 %v1535_v52, 0.0 }
 0x26f   :  { %v1873_v47 = vpop.f32.mrb[12].mxu1 }
 0x270   :  { %v2028_v63 = vpack.c.bf16 %v1551_v42, %v1550_v31  ;;  %v1874_v59 = vpop.f32.mrb[13].mxu1 }
 0x271   :  { %v1875_v15 = vadd.f32 %v1874_v59, %v1873_v47 }
 0x272   :  { %2030 = vmatpush3.bf16.xpose.msk.msra.mxu0 %vm3448_vm1, %v2028_v63 }
 0x273   :  { %2031 = vmatprep.subr.bf16.mxu0 %v2275_v9 }
 0x276   :  { %v1793_v14 = vpop.f32.mrb[12].mxu0 }
 0x277   :  { %v1794_v1 = vpop.f32.mrb[13].mxu0  ;;  %v1876_v50 = vpop.f32.mrb[14].mxu1 }
 0x278   :  { %v1795_v41 = vadd.f32 %v1794_v1, %v1793_v14  ;;  %v1877_v56 = vpop.f32.mrb[15].mxu1 }
 0x279   :  { %v1878_v2 = vadd.f32 %v1877_v56, %v1876_v50 }
 0x27a   :  { %v1475_v51 = vadd.f32 %v1875_v15, %v1795_v41  ;;  %v1796_v58 = vpop.f32.mrb[14].mxu0 }
 0x27b   :  { %v1797_v46 = vpop.f32.mrb[15].mxu0 }
 0x27c   :  { %v1798_v43 = vadd.f32 %v1797_v46, %v1796_v58  ;;  %v1536_v39 = vadd.f32 %v3442_v11, %v1475_v51 }
 0x27e   :  { %v1480_v3 = vadd.f32 %v1878_v2, %v1798_v43  ;;  %v1552_v24 = vmax.f32 %v1536_v39, 0.0 }
 0x280   :  { %v1537_v25 = vadd.f32 %v3442_v11, %v1480_v3 }
 0x282   :  { %v1553_v40 = vmax.f32 %v1537_v25, 0.0 }
 0x284   :  { %v2032_v4 = vpack.c.bf16 %v1553_v40, %v1552_v24 }
 0x286   :  { %2034 = vmatpush3.bf16.xpose.msk.msra.mxu0 %vm3448_vm1, %v2032_v4 }
 0x287   :  { %2035 = vmatprep.subr.bf16.mxu0 %v2275_v9 }
 0x28e   :  { %v1879_v20 = vpop.f32.mrb[16].mxu1 }
 0x28f   :  { %v1880_v36 = vpop.f32.mrb[17].mxu1 }
 0x290   :  { %v1881_v35 = vadd.f32 %v1880_v36, %v1879_v20 }
 0x295   :  { %v1799_v55 = vpop.f32.mrb[16].mxu0 }
 0x296   :  { %v1800_v44 = vpop.f32.mrb[17].mxu0 }
 0x297   :  { %v1801_v17 = vadd.f32 %v1800_v44, %v1799_v55 }
 0x299   :  { %v1485_v13 = vadd.f32 %v1881_v35, %v1801_v17 }
 0x29b   :  { %v1538_v27 = vadd.f32 %v3442_v11, %v1485_v13 }
 0x29d   :  { %v1554_v53 = vmax.f32 %v1538_v27, 0.0 }
 0x2a2   :  { %v1802_v5 = vpop.f32.mrb[18].mxu0  ;;  %v1882_v30 = vpop.f32.mrb[18].mxu1 }
 0x2a3   :  { %v1803_v38 = vpop.f32.mrb[19].mxu0  ;;  %v1883_v33 = vpop.f32.mrb[19].mxu1 }
 0x2a4   :  { %v1804_v6 = vadd.f32 %v1803_v38, %v1802_v5  ;;  %v1884_v26 = vadd.f32 %v1883_v33, %v1882_v30 }
 0x2a6   :  { %v1490_v48 = vadd.f32 %v1884_v26, %v1804_v6 }
 0x2a8   :  { %v1539_v0 = vadd.f32 %v3442_v11, %v1490_v48 }
 0x2aa   :  { %v1555_v12 = vmax.f32 %v1539_v0, 0.0  ;;  %v1562_v0 = vld [vmem:[%s3505_s5] sm:$0xff] }
 0x2ab   :  { %v1885_v8 = vpop.f32.mrb[20].mxu1 }
 0x2ac   :  { %v2036_v45 = vpack.c.bf16 %v1555_v12, %v1554_v53  ;;  %v1886_v7 = vpop.f32.mrb[21].mxu1 }
 0x2ad   :  { %v1887_v61 = vadd.f32 %v1886_v7, %v1885_v8 }
 0x2ae   :  { %2038 = vmatpush3.bf16.xpose.msk.msra.mxu0 %vm3448_vm1, %v2036_v45 }
 0x2af   :  { %2039 = vmatprep.subr.bf16.mxu0 %v2275_v9 }
 0x2b1   :  { %v1567_v53 = vpop.permute.xlu0 %1566 }
 0x2b2   :  { %v1805_v34 = vpop.f32.mrb[20].mxu0 }
 0x2b3   :  { %v1806_v19 = vpop.f32.mrb[21].mxu0  ;;  %v1888_v32 = vpop.f32.mrb[22].mxu1 }
 0x2b4   :  { %v1807_v10 = vadd.f32 %v1806_v19, %v1805_v34  ;;  %v1889_v54 = vpop.f32.mrb[23].mxu1 }
 0x2b5   :  { %v1890_v22 = vadd.f32 %v1889_v54, %v1888_v32 }
 0x2b6   :  { %v1495_v29 = vadd.f32 %v1887_v61, %v1807_v10  ;;  %v1808_v18 = vpop.f32.mrb[22].mxu0 }
 0x2b7   :  { %v1809_v21 = vpop.f32.mrb[23].mxu0 }
 0x2b8   :  { %v1810_v49 = vadd.f32 %v1809_v21, %v1808_v18  ;;  %v1540_v23 = vadd.f32 %v3442_v11, %v1495_v29 }
 0x2ba   :  { %v1500_v16 = vadd.f32 %v1890_v22, %v1810_v49  ;;  %v1556_v37 = vmax.f32 %v1540_v23, 0.0 }
 0x2bc   :  { %v1541_v62 = vadd.f32 %v3442_v11, %v1500_v16 }
 0x2be   :  { %v1557_v28 = vmax.f32 %v1541_v62, 0.0 }
 0x2c0   :  { %v2040_v52 = vpack.c.bf16 %v1557_v28, %v1556_v37 }
 0x2c2   :  { %2042 = vmatpush3.bf16.xpose.msk.msra.mxu0 %vm3448_vm1, %v2040_v52 }
 0x2c3   :  { %2043 = vmatprep.subr.bf16.mxu0 %v2275_v9 }
 0x2ca   :  { %v1891_v31 = vpop.f32.mrb[24].mxu1 }
 0x2cb   :  { %v1892_v42 = vpop.f32.mrb[25].mxu1 }
 0x2cc   :  { %v1893_v47 = vadd.f32 %v1892_v42, %v1891_v31 }
 0x2d1   :  { %v1811_v63 = vpop.f32.mrb[24].mxu0 }
 0x2d2   :  { %v1812_v59 = vpop.f32.mrb[25].mxu0  ;;  %v1894_v15 = vpop.f32.mrb[26].mxu1 }
 0x2d3   :  { %v1813_v57 = vadd.f32 %v1812_v59, %v1811_v63  ;;  %v1895_v14 = vpop.f32.mrb[27].mxu1 }
 0x2d4   :  { %v1896_v1 = vadd.f32 %v1895_v14, %v1894_v15 }
 0x2d5   :  { %v1505_v50 = vadd.f32 %v1893_v47, %v1813_v57  ;;  %v1814_v41 = vpop.f32.mrb[26].mxu0 }
 0x2d6   :  { %v1815_v56 = vpop.f32.mrb[27].mxu0  ;;  %v1897_v2 = vpop.f32.mrb[28].mxu1 }
 0x2d7   :  { %v1816_v51 = vadd.f32 %v1815_v56, %v1814_v41  ;;  %v1898_v58 = vpop.f32.mrb[29].mxu1  ;;  %v1542_v43 = vadd.f32 %v3442_v11, %v1505_v50 }
 0x2d8   :  { %v1899_v46 = vadd.f32 %v1898_v58, %v1897_v2 }
 0x2d9   :  { %v1510_v39 = vadd.f32 %v1896_v1, %v1816_v51  ;;  %v1817_v3 = vpop.f32.mrb[28].mxu0  ;;  %v1558_v35 = vmax.f32 %v1542_v43, 0.0 }
 0x2da   :  { %v1818_v25 = vpop.f32.mrb[29].mxu0  ;;  %v1900_v24 = vpop.f32.mrb[30].mxu1 }
 0x2db   :  { %v1543_v40 = vadd.f32 %v3442_v11, %v1510_v39  ;;  %v1819_v4 = vadd.f32 %v1818_v25, %v1817_v3  ;;  %v1901_v20 = vpop.f32.mrb[31].mxu1 }
 0x2dc   :  { %v1902_v36 = vadd.f32 %v1901_v20, %v1900_v24 }
 0x2dd   :  { %v1559_v55 = vmax.f32 %v1543_v40, 0.0  ;;  %v1515_v44 = vadd.f32 %v1899_v46, %v1819_v4  ;;  %v1820_v17 = vpop.f32.mrb[30].mxu0 }
 0x2de   :  { %v1821_v13 = vpop.f32.mrb[31].mxu0 }
 0x2df   :  { %v2044_v5 = vpack.c.bf16 %v1559_v55, %v1558_v35  ;;  %v1822_v30 = vadd.f32 %v1821_v13, %v1820_v17  ;;  %v1544_v38 = vadd.f32 %v3442_v11, %v1515_v44 }
 0x2e1   :  { %v1520_v33 = vadd.f32 %v1902_v36, %v1822_v30  ;;  %2046 = vmatpush3.bf16.xpose.msk.msra.mxu0 %vm3448_vm1, %v2044_v5  ;;  %v1560_v26 = vmax.f32 %v1544_v38, 0.0 }
 0x2e2   :  { %2047 = vmatprep.subr.bf16.mxu0 %v2275_v9 }
 0x2e3   :  { %v1545_v6 = vadd.f32 %v3442_v11, %v1520_v33 }
 0x2e5   :  { %v1561_v27 = vmax.f32 %v1545_v6, 0.0 }
 0x2e7   :  { %v2048_v48 = vpack.c.bf16 %v1561_v27, %v1560_v26 }
 0x2e9   :  { %2050 = vmatpush3.bf16.xpose.msk.msra.mxu0 %vm3448_vm1, %v2048_v48 }
 0x2f0   :  { %1953 = vmatmul.mubr.msk.f32.vlgmr.msra.gmra.mrb[32].mxu0 %vm674_vm0, %v1562_v0 }
 0x3c3   :  { %v1686_v12 = vpop.f32.mrb[32].mxu0 }
 0x3c4   :  { %v1687_v8 = vadd.f32 %v1686_v12, %v1567_v53  ;;  %v1954_v45 = vpop.f32.mrb[33].mxu0 }
 0x3c6   :  { %1690 = vst [vmem:[%s3506_s7] sm:$0xff] %v1687_v8 }

</bundles_post_ra>
